<compile_context>
chip_gen: v7x
topology: tpu7x:2x2x1
jax: 0.10.0
libtpu: 0.0.40
codegen_flags: <defaults>
</compile_context>

<pallas_src>
import functools

import jax
import jax.numpy as jnp
from jax import lax
from jax.experimental import pallas as pl
from jax.experimental.pallas import tpu as pltpu

LANE = 128
_SQRT_HALF = 0.7071067811865476  # 1/sqrt(2)
_LN_EPS = 1e-12                  # matches nn.LayerNorm(hidden_dim, eps=1e-12)
_NEG_INF = -1e30
_VMEM_LIMIT = 48 * 1024 * 1024   # explicit scoped-VMEM budget (safe on v7x's 64 MiB)


def _round_up(x, m):
    return ((x + m - 1) // m) * m


def _gelu(x):
    # exact (erf) GELU, matching torch.nn.functional.gelu default
    return 0.5 * x * (1.0 + lax.erf(x * _SQRT_HALF))


def _masked_layernorm(h, g, b, n_real, lane_mask):
    """LayerNorm over the first `n_real` lanes of the last dim (padded lanes stay 0)."""
    inv_n = 1.0 / float(n_real)
    mu = jnp.sum(h, axis=-1, keepdims=True) * inv_n
    d = jnp.where(lane_mask, h - mu, 0.0)
    var = jnp.sum(d * d, axis=-1, keepdims=True) * inv_n
    return d * lax.rsqrt(var + _LN_EPS) * g + b


# ----------------------------- kernels ---------------------------------------


def _linear_kernel(x_ref, w_ref, b_ref, o_ref, *, act):
    # bf16 operands, f32 accumulation on the MXU.
    y = jnp.dot(x_ref[...].astype(jnp.bfloat16), w_ref[...],
                preferred_element_type=jnp.float32)
    y = y + b_ref[...]
    if act == "relu":
        y = jnp.maximum(y, 0.0)
    elif act == "gelu":
        y = _gelu(y)
    o_ref[...] = y


def pallas_linear(x, w_bf16, b_row, *, act=None, tm):
    """Row-blocked y = act(x @ W + b).  W is pre-cast bf16, K/N are <= a few hundred
    so a single K/N block is kept per step (full (tm,tn,tk) tiling only needed at
    much larger hidden sizes)."""
    n_pad, fin = x.shape
    fout = w_bf16.shape[1]
    return pl.pallas_call(
        functools.partial(_linear_kernel, act=act),
        out_shape=jax.ShapeDtypeStruct((n_pad, fout), jnp.float32),
        grid_spec=pltpu.PrefetchScalarGridSpec(
            num_scalar_prefetch=0,
            grid=(n_pad // tm,),
            in_specs=[
                pl.BlockSpec((tm, fin), lambda i: (i, 0)),
                pl.BlockSpec((fin, fout), lambda i: (0, 0)),
                pl.BlockSpec((1, fout), lambda i: (0, 0)),
            ],
            out_specs=pl.BlockSpec((tm, fout), lambda i: (i, 0)),
        ),
        compiler_params=pltpu.CompilerParams(
            dimension_semantics=("parallel",),
            vmem_limit_bytes=_VMEM_LIMIT,
        ),
    )(x, w_bf16, b_row)


def _fused_layer_kernel(xp_ref, adj_ref, prex_ref,
                        asrc_ref, adst_ref, gatb_ref,
                        lng_ref, lnb_ref,
                        midw_ref, midb_ref, resw_ref, resb_ref,
                        rlng_ref, rlnb_ref,
                        o_ref, *, h_real):
    tm, hp = o_ref.shape
    lane_mask = lax.broadcasted_iota(jnp.int32, (1, hp), 1) < h_real

    xp_full = xp_ref[...]                                              # (Np, Hp) f32
    row0 = pl.multiple_of(pl.program_id(0) * tm, 8)
    xp_blk = xp_ref[pl.ds(row0, tm), :]                                # (tm, Hp) f32

    # ---- GATConv attention (heads=1, negative_slope=0.2, add_self_loops) ----
    s_dst = lax.dot_general(xp_blk, adst_ref[...], (((1,), (1,)), ((), ())),
                            preferred_element_type=jnp.float32)        # (tm, 1)
    s_src = lax.dot_general(asrc_ref[...], xp_full, (((1,), (1,)), ((), ())),
                            preferred_element_type=jnp.float32)        # (1, Np)
    e = s_dst + s_src                                                  # e[i,j], edge j->i
    e = jnp.where(e > 0.0, e, 0.2 * e)                                 # leaky_relu(0.2)
    e = jnp.where(adj_ref[...] > 0.0, e, _NEG_INF)
    e = e - jnp.max(e, axis=-1, keepdims=True)
    p = jnp.exp(e)                                                     # masked -> exactly 0
    rowsum = jnp.sum(p, axis=-1, keepdims=True)
    agg = jnp.dot(p.astype(jnp.bfloat16), xp_full.astype(jnp.bfloat16),
                  preferred_element_type=jnp.float32)                  # (tm, Hp)
    # post-matmul row scale (EUP reciprocal) instead of an NxN divide
    agg = agg * pl.reciprocal(rowsum, approx=True) + gatb_ref[...]
    # TODO(synk): attention-coefficient / feature dropout are identity in eval mode.
    h = _gelu(agg)

    # ---- shared LayerNorm(pre_x + h) ----
    h1 = _masked_layernorm(h + prex_ref[...], lng_ref[...], lnb_ref[...],
                           h_real, lane_mask)

    # ---- Output block: dense_mid -> gelu -> dense_out -> LN(h1 + out) ----
    mid = jnp.dot(h1.astype(jnp.bfloat16), midw_ref[...],
                  preferred_element_type=jnp.float32) + midb_ref[...]
    mid = _gelu(mid)
    res = jnp.dot(mid.astype(jnp.bfloat16), resw_ref[...],
                  preferred_element_type=jnp.float32) + resb_ref[...]
    o_ref[...] = _masked_layernorm(h1 + res, rlng_ref[...], rlnb_ref[...],
                                   h_real, lane_mask)


def pallas_fused_layer(xp, adj, pre_x, lp, ln_g, ln_b, *, tm, h_real):
    n_pad, hp = xp.shape
    mp = lp["mid_w"].shape[1]
    # TODO(synk): for very large N, stream the column (j) axis flash-attention
    # style with a running row-max/row-sum instead of holding (tm, Np) in VMEM.
    return pl.pallas_call(
        functools.partial(_fused_layer_kernel, h_real=h_real),
        out_shape=jax.ShapeDtypeStruct((n_pad, hp), jnp.float32),
        grid_spec=pltpu.PrefetchScalarGridSpec(
            num_scalar_prefetch=0,
            grid=(n_pad // tm,),
            in_specs=[
                pl.BlockSpec((n_pad, hp), lambda i: (0, 0)),  # xp (resident across steps)
                pl.BlockSpec((tm, n_pad), lambda i: (i, 0)),  # adj row block (bf16)
                pl.BlockSpec((tm, hp), lambda i: (i, 0)),     # pre_x row block
                pl.BlockSpec((1, hp), lambda i: (0, 0)),      # att_src
                pl.BlockSpec((1, hp), lambda i: (0, 0)),      # att_dst
                pl.BlockSpec((1, hp), lambda i: (0, 0)),      # GATConv bias
                pl.BlockSpec((1, hp), lambda i: (0, 0)),      # shared LN gamma
                pl.BlockSpec((1, hp), lambda i: (0, 0)),      # shared LN beta
                pl.BlockSpec((hp, mp), lambda i: (0, 0)),     # mid_w (bf16)
                pl.BlockSpec((1, mp), lambda i: (0, 0)),      # mid_b
                pl.BlockSpec((mp, hp), lambda i: (0, 0)),     # res_w (bf16)
                pl.BlockSpec((1, hp), lambda i: (0, 0)),      # res_b
                pl.BlockSpec((1, hp), lambda i: (0, 0)),      # Output LN gamma
                pl.BlockSpec((1, hp), lambda i: (0, 0)),      # Output LN beta
            ],
            out_specs=pl.BlockSpec((tm, hp), lambda i: (i, 0)),
        ),
        compiler_params=pltpu.CompilerParams(
            dimension_semantics=("parallel",),
            vmem_limit_bytes=_VMEM_LIMIT,
        ),
    )(xp, adj, pre_x,
      lp["att_src"], lp["att_dst"], lp["gat_b"],
      ln_g, ln_b,
      lp["mid_w"], lp["mid_b"], lp["res_w"], lp["res_b"],
      lp["res_ln_g"], lp["res_ln_b"])


# --------------------------- params / padding ---------------------------------


def init_params(key, input_dim, hidden_dim, output_dim, layer_num):
    middle_dim = hidden_dim * 4

    def nrm(k, shape, scale=0.1):
        return scale * jax.random.normal(k, shape, jnp.float32)

    keys = iter(jax.random.split(key, 8 + layer_num * 10))
    params = {
        "pre_w": nrm(next(keys), (input_dim, hidden_dim)),
        "pre_b": nrm(next(keys), (hidden_dim,)),
        "ln_g": jnp.ones((hidden_dim,), jnp.float32),
        "ln_b": jnp.zeros((hidden_dim,), jnp.float32),
        "out_w": nrm(next(keys), (hidden_dim, output_dim)),
        "out_b": nrm(next(keys), (output_dim,)),
        "layers": [],
    }
    for _ in range(layer_num):
        params["layers"].append({
            "gat_w": nrm(next(keys), (hidden_dim, hidden_dim)),
            "att_src": nrm(next(keys), (hidden_dim,)),
            "att_dst": nrm(next(keys), (hidden_dim,)),
            "gat_b": nrm(next(keys), (hidden_dim,)),
            "mid_w": nrm(next(keys), (hidden_dim, middle_dim)),
            "mid_b": nrm(next(keys), (middle_dim,)),
            "res_w": nrm(next(keys), (middle_dim, hidden_dim)),
            "res_b": nrm(next(keys), (hidden_dim,)),
            "res_ln_g": jnp.ones((hidden_dim,), jnp.float32),
            "res_ln_b": jnp.zeros((hidden_dim,), jnp.float32),
        })
    return params


def _pad2d(a, rows, cols, dtype=None):
    a = jnp.pad(a, ((0, rows - a.shape[0]), (0, cols - a.shape[1])))
    return a.astype(dtype) if dtype is not None else a


def _pad_row(v, cols):
    return jnp.pad(v, (0, cols - v.shape[0])).reshape(1, cols).astype(jnp.float32)


def prepare_params(params, input_dim, hidden_dim, output_dim):
    """Zero-pad feature dims to 128 lanes; pre-cast matmul weights to bf16."""
    fp = _round_up(input_dim, LANE)
    hp = _round_up(hidden_dim, LANE)
    mp = _round_up(4 * hidden_dim, LANE)
    op = _round_up(output_dim, LANE)
    pp = {
        "pre_w": _pad2d(params["pre_w"], fp, hp, jnp.bfloat16),
        "pre_b": _pad_row(params["pre_b"], hp),
        "ln_g": _pad_row(params["ln_g"], hp),
        "ln_b": _pad_row(params["ln_b"], hp),
        "out_w": _pad2d(params["out_w"], hp, op, jnp.bfloat16),
        "out_b": _pad_row(params["out_b"], op),
        "zero_b_h": jnp.zeros((1, hp), jnp.float32),
        "layers": [],
    }
    for lp in params["layers"]:
        pp["layers"].append({
            "gat_w": _pad2d(lp["gat_w"], hp, hp, jnp.bfloat16),
            "att_src": _pad_row(lp["att_src"], hp),
            "att_dst": _pad_row(lp["att_dst"], hp),
            "gat_b": _pad_row(lp["gat_b"], hp),
            "mid_w": _pad2d(lp["mid_w"], hp, mp, jnp.bfloat16),
            "mid_b": _pad_row(lp["mid_b"], mp),
            "res_w": _pad2d(lp["res_w"], mp, hp, jnp.bfloat16),
            "res_b": _pad_row(lp["res_b"], hp),
            "res_ln_g": _pad_row(lp["res_ln_g"], hp),
            "res_ln_b": _pad_row(lp["res_ln_b"], hp),
        })
    return pp


def build_dense_adj(edge_index, num_nodes, num_nodes_padded):
    """adj[i, j] = 1 iff edge j -> i (edge_index[0]=src, edge_index[1]=dst), plus
    self-loops (GATConv add_self_loops=True).  Stored as bf16 to halve HBM/VMEM
    traffic of the N x N mask.  Padded nodes get self-loops only (isolated)."""
    src, dst = edge_index[0], edge_index[1]
    adj = jnp.zeros((num_nodes_padded, num_nodes_padded), jnp.float32)
    adj = adj.at[dst, src].set(1.0)
    adj = jnp.maximum(adj, jnp.eye(num_nodes_padded, dtype=jnp.float32))
    return adj.astype(jnp.bfloat16)


# --------------------------- model forward ------------------------------------


def gat_forward(pp, x_pad, adj_pad, *, layer_num, hidden_dim, tm):
    # feature_pre: linear + relu (dropout = identity in eval)
    x = pallas_linear(x_pad, pp["pre_w"], pp["pre_b"], act="relu", tm=tm)
    pre_x = x
    for i in range(layer_num):
        lp = pp["layers"][i]
        # GATConv node transform x' = x @ W (lin_src, bias handled post-aggregation)
        xp = pallas_linear(x, lp["gat_w"], pp["zero_b_h"], act=None, tm=tm)
        # fused: attention + aggregation + gelu + shared LN(pre_x + .) + Output block
        x = pallas_fused_layer(xp, adj_pad, pre_x, lp, pp["ln_g"], pp["ln_b"],
                               tm=tm, h_real=hidden_dim)
        # trailing dropout = identity (eval)
    # out linear; the un-assigned F.dropout in the reference is a no-op; then relu
    x = pallas_linear(x, pp["out_w"], pp["out_b"], act="relu", tm=tm)
    return x


if __name__ == "__main__":
    N_NODES = 16
    INPUT_DIM = 8
    HIDDEN_DIM = 32
    OUTPUT_DIM = 8
    LAYER_NUM = 2

    key = jax.random.PRNGKey(0)
    k_x, k_p = jax.random.split(key)

    x = jax.random.normal(k_x, (N_NODES, INPUT_DIM), jnp.float32)

    # simple deterministic graph: bidirectional ring (no duplicate edges)
    idx = jnp.arange(N_NODES)
    src = jnp.concatenate([idx, (idx + 1) % N_NODES])
    dst = jnp.concatenate([(idx + 1) % N_NODES, idx])
    edge_index = jnp.stack([src, dst])           # shape (2, 32)

    # padded sizes: nodes -> multiple of the row block, features -> 128 lanes
    n_sub = _round_up(N_NODES, 8)
    TM = min(128, n_sub)
    N_PAD = _round_up(n_sub, TM)
    F_PAD = _round_up(INPUT_DIM, LANE)

    params = init_params(k_p, INPUT_DIM, HIDDEN_DIM, OUTPUT_DIM, LAYER_NUM)
    pp = prepare_params(params, INPUT_DIM, HIDDEN_DIM, OUTPUT_DIM)

    adj = build_dense_adj(edge_index, N_NODES, N_PAD)
    x_pad = jnp.pad(x, ((0, N_PAD - N_NODES), (0, F_PAD - INPUT_DIM)))

    fwd = jax.jit(functools.partial(gat_forward, layer_num=LAYER_NUM,
                                    hidden_dim=HIDDEN_DIM, tm=TM))
    out_pad = fwd(pp, x_pad, adj)
    out_pad = jax.block_until_ready(out_pad)
    out = out_pad[:N_NODES, :OUTPUT_DIM]

    assert out.shape == (N_NODES, OUTPUT_DIM)
    assert jnp.all(jnp.isfinite(out))
    print("KERNEL_OK")
</pallas_src>

<mosaic_0001>
module attributes {stable_mosaic.version = 11 : i64} {
  func.func @_linear_kernel(%arg0: i32, %arg1: memref<16x128xf32, #tpu.memory_space<vmem>>, %arg2: memref<128x128xbf16, #tpu.memory_space<vmem>>, %arg3: memref<1x128xf32, #tpu.memory_space<vmem>>, %arg4: memref<16x128xf32, #tpu.memory_space<vmem>>) attributes {dimension_semantics = [#tpu.dimension_semantics<parallel>], iteration_bounds = array<i64: 1>, scalar_prefetch = 0 : i64, scratch_operands = 0 : i64, tpu.core_type = #tpu.core_type<tc>, window_params = [{transform_indices = @transform_0, window_bounds = array<i64: 16, 128>}, {pipeline_mode = #tpu.pipeline_mode<synchronous>, transform_indices = @transform_1, window_bounds = array<i64: 128, 128>}, {pipeline_mode = #tpu.pipeline_mode<synchronous>, transform_indices = @transform_2, window_bounds = array<i64: 1, 128>}, {transform_indices = @transform_3, window_bounds = array<i64: 16, 128>}]} {
    %c0 = arith.constant 0 : index
    %c0_0 = arith.constant 0 : index
    %0 = vector.load %arg1[%c0, %c0_0] : memref<16x128xf32, #tpu.memory_space<vmem>>, vector<16x128xf32>
    %1 = arith.truncf %0 : vector<16x128xf32> to vector<16x128xbf16>
    %c0_1 = arith.constant 0 : index
    %c0_2 = arith.constant 0 : index
    %2 = vector.load %arg2[%c0_1, %c0_2] : memref<128x128xbf16, #tpu.memory_space<vmem>>, vector<128x128xbf16>
    %cst = arith.constant dense<0.000000e+00> : vector<16x128xf32>
    %3 = tpu.matmul %1, %2, %cst {dimension_numbers = #tpu.dot_dimension_numbers<[1], [0], [0], [1], [0, 0, 1, 1], [], []>} : vector<16x128xbf16>, vector<128x128xbf16>, vector<16x128xf32> -> vector<16x128xf32>
    %c0_3 = arith.constant 0 : index
    %c0_4 = arith.constant 0 : index
    %4 = vector.load %arg3[%c0_3, %c0_4] : memref<1x128xf32, #tpu.memory_space<vmem>>, vector<1x128xf32>
    %5 = vector.broadcast %4 : vector<1x128xf32> to vector<16x128xf32>
    %6 = arith.addf %3, %5 : vector<16x128xf32>
    %c0_5 = arith.constant 0 : index
    %c0_6 = arith.constant 0 : index
    %7 = vector.load %arg4[%c0_5, %c0_6] : memref<16x128xf32, #tpu.memory_space<vmem>>, vector<16x128xf32>
    tpu.vector_store %arg4[%c0_5, %c0_6], %6 {strides = array<i32>} : memref<16x128xf32, #tpu.memory_space<vmem>>, vector<16x128xf32>,
    return
  }
  func.func @transform_0(%arg0: i32) -> (i32, i32) {
    %c0_i32 = arith.constant 0 : i32
    %c0_i32_0 = arith.constant 0 : i32
    return %arg0, %c0_i32 : i32, i32
  }
  func.func @transform_1(%arg0: i32) -> (i32, i32) {
    %c0_i32 = arith.constant 0 : i32
    %c0_i32_0 = arith.constant 0 : i32
    %c0_i32_1 = arith.constant 0 : i32
    return %c0_i32, %c0_i32_0 : i32, i32
  }
  func.func @transform_2(%arg0: i32) -> (i32, i32) {
    %c0_i32 = arith.constant 0 : i32
    %c0_i32_0 = arith.constant 0 : i32
    %c0_i32_1 = arith.constant 0 : i32
    return %c0_i32, %c0_i32_0 : i32, i32
  }
  func.func @transform_3(%arg0: i32) -> (i32, i32) {
    %c0_i32 = arith.constant 0 : i32
    %c0_i32_0 = arith.constant 0 : i32
    return %arg0, %c0_i32 : i32, i32
  }
}

module attributes {stable_mosaic.version = 11 : i64} {
  func.func @_linear_kernel(%arg0: i32, %arg1: memref<16x128xf32, #tpu.memory_space<vmem>>, %arg2: memref<128x128xbf16, #tpu.memory_space<vmem>>, %arg3: memref<1x128xf32, #tpu.memory_space<vmem>>, %arg4: memref<16x128xf32, #tpu.memory_space<vmem>>) attributes {dimension_semantics = [#tpu.dimension_semantics<parallel>], iteration_bounds = array<i64: 1>, scalar_prefetch = 0 : i64, scratch_operands = 0 : i64, tpu.core_type = #tpu.core_type<tc>, window_params = [{transform_indices = @transform_0, window_bounds = array<i64: 16, 128>}, {pipeline_mode = #tpu.pipeline_mode<synchronous>, transform_indices = @transform_1, window_bounds = array<i64: 128, 128>}, {pipeline_mode = #tpu.pipeline_mode<synchronous>, transform_indices = @transform_2, window_bounds = array<i64: 1, 128>}, {transform_indices = @transform_3, window_bounds = array<i64: 16, 128>}]} {
    %c0 = arith.constant 0 : index
    %c0_0 = arith.constant 0 : index
    %0 = vector.load %arg1[%c0, %c0_0] : memref<16x128xf32, #tpu.memory_space<vmem>>, vector<16x128xf32>
    %1 = arith.truncf %0 : vector<16x128xf32> to vector<16x128xbf16>
    %c0_1 = arith.constant 0 : index
    %c0_2 = arith.constant 0 : index
    %2 = vector.load %arg2[%c0_1, %c0_2] : memref<128x128xbf16, #tpu.memory_space<vmem>>, vector<128x128xbf16>
    %cst = arith.constant dense<0.000000e+00> : vector<16x128xf32>
    %3 = tpu.matmul %1, %2, %cst {dimension_numbers = #tpu.dot_dimension_numbers<[1], [0], [0], [1], [0, 0, 1, 1], [], []>} : vector<16x128xbf16>, vector<128x128xbf16>, vector<16x128xf32> -> vector<16x128xf32>
    %c0_3 = arith.constant 0 : index
    %c0_4 = arith.constant 0 : index
    %4 = vector.load %arg3[%c0_3, %c0_4] : memref<1x128xf32, #tpu.memory_space<vmem>>, vector<1x128xf32>
    %5 = vector.broadcast %4 : vector<1x128xf32> to vector<16x128xf32>
    %6 = arith.addf %3, %5 : vector<16x128xf32>
    %cst_5 = arith.constant 0.000000e+00 : f32
    %7 = vector.broadcast %cst_5 : f32 to vector<16x128xf32>
    %8 = arith.maximumf %6, %7 : vector<16x128xf32>
    %c0_6 = arith.constant 0 : index
    %c0_7 = arith.constant 0 : index
    %9 = vector.load %arg4[%c0_6, %c0_7] : memref<16x128xf32, #tpu.memory_space<vmem>>, vector<16x128xf32>
    tpu.vector_store %arg4[%c0_6, %c0_7], %8 {strides = array<i32>} : memref<16x128xf32, #tpu.memory_space<vmem>>, vector<16x128xf32>,
    return
  }
  func.func @transform_0(%arg0: i32) -> (i32, i32) {
    %c0_i32 = arith.constant 0 : i32
    %c0_i32_0 = arith.constant 0 : i32
    return %arg0, %c0_i32 : i32, i32
  }
  func.func @transform_1(%arg0: i32) -> (i32, i32) {
    %c0_i32 = arith.constant 0 : i32
    %c0_i32_0 = arith.constant 0 : i32
    %c0_i32_1 = arith.constant 0 : i32
    return %c0_i32, %c0_i32_0 : i32, i32
  }
  func.func @transform_2(%arg0: i32) -> (i32, i32) {
    %c0_i32 = arith.constant 0 : i32
    %c0_i32_0 = arith.constant 0 : i32
    %c0_i32_1 = arith.constant 0 : i32
    return %c0_i32, %c0_i32_0 : i32, i32
  }
  func.func @transform_3(%arg0: i32) -> (i32, i32) {
    %c0_i32 = arith.constant 0 : i32
    %c0_i32_0 = arith.constant 0 : i32
    return %arg0, %c0_i32 : i32, i32
  }
}

module attributes {stable_mosaic.version = 11 : i64} {
  func.func @_fused_layer_kernel(%arg0: i32, %arg1: memref<16x128xf32, #tpu.memory_space<vmem>>, %arg2: memref<16x16xbf16, #tpu.memory_space<vmem>>, %arg3: memref<16x128xf32, #tpu.memory_space<vmem>>, %arg4: memref<1x128xf32, #tpu.memory_space<vmem>>, %arg5: memref<1x128xf32, #tpu.memory_space<vmem>>, %arg6: memref<1x128xf32, #tpu.memory_space<vmem>>, %arg7: memref<1x128xf32, #tpu.memory_space<vmem>>, %arg8: memref<1x128xf32, #tpu.memory_space<vmem>>, %arg9: memref<128x128xbf16, #tpu.memory_space<vmem>>, %arg10: memref<1x128xf32, #tpu.memory_space<vmem>>, %arg11: memref<128x128xbf16, #tpu.memory_space<vmem>>, %arg12: memref<1x128xf32, #tpu.memory_space<vmem>>, %arg13: memref<1x128xf32, #tpu.memory_space<vmem>>, %arg14: memref<1x128xf32, #tpu.memory_space<vmem>>, %arg15: memref<16x128xf32, #tpu.memory_space<vmem>>) attributes {dimension_semantics = [#tpu.dimension_semantics<parallel>], iteration_bounds = array<i64: 1>, scalar_prefetch = 0 : i64, scratch_operands = 0 : i64, tpu.core_type = #tpu.core_type<tc>, window_params = [{pipeline_mode = #tpu.pipeline_mode<synchronous>, transform_indices = @transform_0, window_bounds = array<i64: 16, 128>}, {transform_indices = @transform_1, window_bounds = array<i64: 16, 16>}, {transform_indices = @transform_2, window_bounds = array<i64: 16, 128>}, {pipeline_mode = #tpu.pipeline_mode<synchronous>, transform_indices = @transform_3, window_bounds = array<i64: 1, 128>}, {pipeline_mode = #tpu.pipeline_mode<synchronous>, transform_indices = @transform_4, window_bounds = array<i64: 1, 128>}, {pipeline_mode = #tpu.pipeline_mode<synchronous>, transform_indices = @transform_5, window_bounds = array<i64: 1, 128>}, {pipeline_mode = #tpu.pipeline_mode<synchronous>, transform_indices = @transform_6, window_bounds = array<i64: 1, 128>}, {pipeline_mode = #tpu.pipeline_mode<synchronous>, transform_indices = @transform_7, window_bounds = array<i64: 1, 128>}, {pipeline_mode = #tpu.pipeline_mode<synchronous>, transform_indices = @transform_8, window_bounds = array<i64: 128, 128>}, {pipeline_mode = #tpu.pipeline_mode<synchronous>, transform_indices = @transform_9, window_bounds = array<i64: 1, 128>}, {pipeline_mode = #tpu.pipeline_mode<synchronous>, transform_indices = @transform_10, window_bounds = array<i64: 128, 128>}, {pipeline_mode = #tpu.pipeline_mode<synchronous>, transform_indices = @transform_11, window_bounds = array<i64: 1, 128>}, {pipeline_mode = #tpu.pipeline_mode<synchronous>, transform_indices = @transform_12, window_bounds = array<i64: 1, 128>}, {pipeline_mode = #tpu.pipeline_mode<synchronous>, transform_indices = @transform_13, window_bounds = array<i64: 1, 128>}, {transform_indices = @transform_14, window_bounds = array<i64: 16, 128>}]} {
    %0 = tpu.iota {dimensions = array<i32: 1>} : vector<1x128xi32>
    %c32_i32 = arith.constant 32 : i32
    %1 = vector.broadcast %c32_i32 : i32 to vector<1x128xi32>
    %2 = arith.cmpi slt, %0, %1 : vector<1x128xi32>
    %c0 = arith.constant 0 : index
    %c0_0 = arith.constant 0 : index
    %3 = vector.load %arg1[%c0, %c0_0] : memref<16x128xf32, #tpu.memory_space<vmem>>, vector<16x128xf32>
    %c16_i32 = arith.constant 16 : i32
    %4 = arith.muli %arg0, %c16_i32 : i32
    %5 = tpu.assume_multiple %4, 8 : i32
    %6 = arith.index_cast %5 : i32 to index
    %c0_1 = arith.constant 0 : index
    %7 = vector.load %arg1[%6, %c0_1] : memref<16x128xf32, #tpu.memory_space<vmem>>, vector<16x128xf32>
    %c0_2 = arith.constant 0 : index
    %c0_3 = arith.constant 0 : index
    %8 = vector.load %arg5[%c0_2, %c0_3] : memref<1x128xf32, #tpu.memory_space<vmem>>, vector<1x128xf32>
    %cst = arith.constant dense<0.000000e+00> : vector<16x1xf32>
    %9 = tpu.matmul %7, %8, %cst {dimension_numbers = #tpu.dot_dimension_numbers<[1], [1], [0], [0], [0, 0, 1, 0], [], []>} : vector<16x128xf32>, vector<1x128xf32>, vector<16x1xf32> -> vector<16x1xf32>
    %c0_4 = arith.constant 0 : index
    %c0_5 = arith.constant 0 : index
    %10 = vector.load %arg4[%c0_4, %c0_5] : memref<1x128xf32, #tpu.memory_space<vmem>>, vector<1x128xf32>
    %cst_6 = arith.constant dense<0.000000e+00> : vector<1x16xf32>
    %11 = tpu.matmul %10, %3, %cst_6 {dimension_numbers = #tpu.dot_dimension_numbers<[1], [1], [0], [0], [0, 0, 1, 0], [], []>} : vector<1x128xf32>, vector<16x128xf32>, vector<1x16xf32> -> vector<1x16xf32>
    %12 = vector.broadcast %9 : vector<16x1xf32> to vector<16x16xf32>
    %13 = vector.broadcast %11 : vector<1x16xf32> to vector<16x16xf32>
    %14 = arith.addf %12, %13 : vector<16x16xf32>
    %cst_7 = arith.constant 0.000000e+00 : f32
    %15 = vector.broadcast %cst_7 : f32 to vector<16x16xf32>
    %16 = arith.cmpf ogt, %14, %15 : vector<16x16xf32>
    %cst_8 = arith.constant 2.000000e-01 : f32
    %17 = vector.broadcast %cst_8 : f32 to vector<16x16xf32>
    %18 = arith.mulf %17, %14 : vector<16x16xf32>
    %19 = arith.select %16, %14, %18 : vector<16x16xi1>, vector<16x16xf32>
    %c0_9 = arith.constant 0 : index
    %c0_10 = arith.constant 0 : index
    %20 = vector.load %arg2[%c0_9, %c0_10] : memref<16x16xbf16, #tpu.memory_space<vmem>>, vector<16x16xbf16>
    %cst_11 = arith.constant 0.000000e+00 : bf16
    %21 = vector.broadcast %cst_11 : bf16 to vector<16x16xbf16>
    %22 = arith.cmpf ogt, %20, %21 : vector<16x16xbf16>
    %cst_12 = arith.constant -1.000000e+30 : f32
    %23 = vector.broadcast %cst_12 : f32 to vector<16x16xf32>
    %24 = arith.select %22, %19, %23 : vector<16x16xi1>, vector<16x16xf32>
    %cst_13 = arith.constant dense<0xFF800000> : vector<16xf32>
    %25 = vector.multi_reduction <maximumf>, %24, %cst_13 [1] : vector<16x16xf32> to vector<16xf32>
    %26 = vector.shape_cast %25 : vector<16xf32> to vector<16x1xf32>
    %27 = vector.broadcast %26 : vector<16x1xf32> to vector<16x16xf32>
    %28 = arith.subf %24, %27 : vector<16x16xf32>
    %29 = math.exp %28 : vector<16x16xf32>
    %cst_14 = arith.constant dense<0.000000e+00> : vector<16xf32>
    %30 = vector.multi_reduction <add>, %29, %cst_14 [1] : vector<16x16xf32> to vector<16xf32>
    %31 = vector.shape_cast %30 : vector<16xf32> to vector<16x1xf32>
    %32 = arith.truncf %29 : vector<16x16xf32> to vector<16x16xbf16>
    %33 = arith.truncf %3 : vector<16x128xf32> to vector<16x128xbf16>
    %cst_15 = arith.constant dense<0.000000e+00> : vector<16x128xf32>
    %34 = tpu.matmul %32, %33, %cst_15 {dimension_numbers = #tpu.dot_dimension_numbers<[1], [0], [0], [1], [0, 0, 1, 1], [], []>} : vector<16x16xbf16>, vector<16x128xbf16>, vector<16x128xf32> -> vector<16x128xf32>
    %35 = tpu.reciprocal %31 {approx = true} : vector<16x1xf32> -> vector<16x1xf32>
    %36 = vector.broadcast %35 : vector<16x1xf32> to vector<16x128xf32>
    %37 = arith.mulf %34, %36 : vector<16x128xf32>
    %c0_16 = arith.constant 0 : index
    %c0_17 = arith.constant 0 : index
    %38 = vector.load %arg6[%c0_16, %c0_17] : memref<1x128xf32, #tpu.memory_space<vmem>>, vector<1x128xf32>
    %39 = vector.broadcast %38 : vector<1x128xf32> to vector<16x128xf32>
    %40 = arith.addf %37, %39 : vector<16x128xf32>
    %cst_18 = arith.constant 5.000000e-01 : f32
    %41 = vector.broadcast %cst_18 : f32 to vector<16x128xf32>
    %42 = arith.mulf %41, %40 : vector<16x128xf32>
    %cst_19 = arith.constant 0.707106769 : f32
    %43 = vector.broadcast %cst_19 : f32 to vector<16x128xf32>
    %44 = arith.mulf %40, %43 : vector<16x128xf32>
    %45 = math.erf %44 : vector<16x128xf32>
    %cst_20 = arith.constant 1.000000e+00 : f32
    %46 = vector.broadcast %cst_20 : f32 to vector<16x128xf32>
    %47 = arith.addf %46, %45 : vector<16x128xf32>
    %48 = arith.mulf %42, %47 : vector<16x128xf32>
    %c0_21 = arith.constant 0 : index
    %c0_22 = arith.constant 0 : index
    %49 = vector.load %arg3[%c0_21, %c0_22] : memref<16x128xf32, #tpu.memory_space<vmem>>, vector<16x128xf32>
    %50 = arith.addf %48, %49 : vector<16x128xf32>
    %c0_23 = arith.constant 0 : index
    %c0_24 = arith.constant 0 : index
    %51 = vector.load %arg7[%c0_23, %c0_24] : memref<1x128xf32, #tpu.memory_space<vmem>>, vector<1x128xf32>
    %c0_25 = arith.constant 0 : index
    %c0_26 = arith.constant 0 : index
    %52 = vector.load %arg8[%c0_25, %c0_26] : memref<1x128xf32, #tpu.memory_space<vmem>>, vector<1x128xf32>
    %cst_27 = arith.constant dense<0.000000e+00> : vector<16xf32>
    %53 = vector.multi_reduction <add>, %50, %cst_27 [1] : vector<16x128xf32> to vector<16xf32>
    %54 = vector.shape_cast %53 : vector<16xf32> to vector<16x1xf32>
    %cst_28 = arith.constant 3.125000e-02 : f32
    %55 = vector.broadcast %cst_28 : f32 to vector<16x1xf32>
    %56 = arith.mulf %54, %55 : vector<16x1xf32>
    %57 = vector.broadcast %56 : vector<16x1xf32> to vector<16x128xf32>
    %58 = arith.subf %50, %57 : vector<16x128xf32>
    %cst_29 = arith.constant 0.000000e+00 : f32
    %59 = vector.shape_cast %2 : vector<1x128xi1> to vector<1x128xi1>
    %60 = vector.broadcast %59 : vector<1x128xi1> to vector<16x128xi1>
    %61 = vector.broadcast %cst_29 : f32 to vector<16x128xf32>
    %62 = arith.select %60, %58, %61 : vector<16x128xi1>, vector<16x128xf32>
    %63 = arith.mulf %62, %62 : vector<16x128xf32>
    %cst_30 = arith.constant dense<0.000000e+00> : vector<16xf32>
    %64 = vector.multi_reduction <add>, %63, %cst_30 [1] : vector<16x128xf32> to vector<16xf32>
    %65 = vector.shape_cast %64 : vector<16xf32> to vector<16x1xf32>
    %cst_31 = arith.constant 3.125000e-02 : f32
    %66 = vector.broadcast %cst_31 : f32 to vector<16x1xf32>
    %67 = arith.mulf %65, %66 : vector<16x1xf32>
    %cst_32 = arith.constant 9.99999996E-13 : f32
    %68 = vector.broadcast %cst_32 : f32 to vector<16x1xf32>
    %69 = arith.addf %67, %68 : vector<16x1xf32>
    %70 = math.rsqrt %69 : vector<16x1xf32>
    %71 = vector.broadcast %70 : vector<16x1xf32> to vector<16x128xf32>
    %72 = arith.mulf %62, %71 : vector<16x128xf32>
    %73 = vector.broadcast %51 : vector<1x128xf32> to vector<16x128xf32>
    %74 = arith.mulf %72, %73 : vector<16x128xf32>
    %75 = vector.broadcast %52 : vector<1x128xf32> to vector<16x128xf32>
    %76 = arith.addf %74, %75 : vector<16x128xf32>
    %77 = arith.truncf %76 : vector<16x128xf32> to vector<16x128xbf16>
    %c0_33 = arith.constant 0 : index
    %c0_34 = arith.constant 0 : index
    %78 = vector.load %arg9[%c0_33, %c0_34] : memref<128x128xbf16, #tpu.memory_space<vmem>>, vector<128x128xbf16>
    %cst_35 = arith.constant dense<0.000000e+00> : vector<16x128xf32>
    %79 = tpu.matmul %77, %78, %cst_35 {dimension_numbers = #tpu.dot_dimension_numbers<[1], [0], [0], [1], [0, 0, 1, 1], [], []>} : vector<16x128xbf16>, vector<128x128xbf16>, vector<16x128xf32> -> vector<16x128xf32>
    %c0_36 = arith.constant 0 : index
    %c0_37 = arith.constant 0 : index
    %80 = vector.load %arg10[%c0_36, %c0_37] : memref<1x128xf32, #tpu.memory_space<vmem>>, vector<1x128xf32>
    %81 = vector.broadcast %80 : vector<1x128xf32> to vector<16x128xf32>
    %82 = arith.addf %79, %81 : vector<16x128xf32>
    %cst_38 = arith.constant 5.000000e-01 : f32
    %83 = vector.broadcast %cst_38 : f32 to vector<16x128xf32>
    %84 = arith.mulf %83, %82 : vector<16x128xf32>
    %cst_39 = arith.constant 0.707106769 : f32
    %85 = vector.broadcast %cst_39 : f32 to vector<16x128xf32>
    %86 = arith.mulf %82, %85 : vector<16x128xf32>
    %87 = math.erf %86 : vector<16x128xf32>
    %cst_40 = arith.constant 1.000000e+00 : f32
    %88 = vector.broadcast %cst_40 : f32 to vector<16x128xf32>
    %89 = arith.addf %88, %87 : vector<16x128xf32>
    %90 = arith.mulf %84, %89 : vector<16x128xf32>
    %91 = arith.truncf %90 : vector<16x128xf32> to vector<16x128xbf16>
    %c0_41 = arith.constant 0 : index
    %c0_42 = arith.constant 0 : index
    %92 = vector.load %arg11[%c0_41, %c0_42] : memref<128x128xbf16, #tpu.memory_space<vmem>>, vector<128x128xbf16>
    %cst_43 = arith.constant dense<0.000000e+00> : vector<16x128xf32>
    %93 = tpu.matmul %91, %92, %cst_43 {dimension_numbers = #tpu.dot_dimension_numbers<[1], [0], [0], [1], [0, 0, 1, 1], [], []>} : vector<16x128xbf16>, vector<128x128xbf16>, vector<16x128xf32> -> vector<16x128xf32>
    %c0_44 = arith.constant 0 : index
    %c0_45 = arith.constant 0 : index
    %94 = vector.load %arg12[%c0_44, %c0_45] : memref<1x128xf32, #tpu.memory_space<vmem>>, vector<1x128xf32>
    %95 = vector.broadcast %94 : vector<1x128xf32> to vector<16x128xf32>
    %96 = arith.addf %93, %95 : vector<16x128xf32>
    %97 = arith.addf %76, %96 : vector<16x128xf32>
    %c0_46 = arith.constant 0 : index
    %c0_47 = arith.constant 0 : index
    %98 = vector.load %arg13[%c0_46, %c0_47] : memref<1x128xf32, #tpu.memory_space<vmem>>, vector<1x128xf32>
    %c0_48 = arith.constant 0 : index
    %c0_49 = arith.constant 0 : index
    %99 = vector.load %arg14[%c0_48, %c0_49] : memref<1x128xf32, #tpu.memory_space<vmem>>, vector<1x128xf32>
    %cst_50 = arith.constant dense<0.000000e+00> : vector<16xf32>
    %100 = vector.multi_reduction <add>, %97, %cst_50 [1] : vector<16x128xf32> to vector<16xf32>
    %101 = vector.shape_cast %100 : vector<16xf32> to vector<16x1xf32>
    %cst_51 = arith.constant 3.125000e-02 : f32
    %102 = vector.broadcast %cst_51 : f32 to vector<16x1xf32>
    %103 = arith.mulf %101, %102 : vector<16x1xf32>
    %104 = vector.broadcast %103 : vector<16x1xf32> to vector<16x128xf32>
    %105 = arith.subf %97, %104 : vector<16x128xf32>
    %cst_52 = arith.constant 0.000000e+00 : f32
    %106 = vector.shape_cast %2 : vector<1x128xi1> to vector<1x128xi1>
    %107 = vector.broadcast %106 : vector<1x128xi1> to vector<16x128xi1>
    %108 = vector.broadcast %cst_52 : f32 to vector<16x128xf32>
    %109 = arith.select %107, %105, %108 : vector<16x128xi1>, vector<16x128xf32>
    %110 = arith.mulf %109, %109 : vector<16x128xf32>
    %cst_53 = arith.constant dense<0.000000e+00> : vector<16xf32>
    %111 = vector.multi_reduction <add>, %110, %cst_53 [1] : vector<16x128xf32> to vector<16xf32>
    %112 = vector.shape_cast %111 : vector<16xf32> to vector<16x1xf32>
    %cst_54 = arith.constant 3.125000e-02 : f32
    %113 = vector.broadcast %cst_54 : f32 to vector<16x1xf32>
    %114 = arith.mulf %112, %113 : vector<16x1xf32>
    %cst_55 = arith.constant 9.99999996E-13 : f32
    %115 = vector.broadcast %cst_55 : f32 to vector<16x1xf32>
    %116 = arith.addf %114, %115 : vector<16x1xf32>
    %117 = math.rsqrt %116 : vector<16x1xf32>
    %118 = vector.broadcast %117 : vector<16x1xf32> to vector<16x128xf32>
    %119 = arith.mulf %109, %118 : vector<16x128xf32>
    %120 = vector.broadcast %98 : vector<1x128xf32> to vector<16x128xf32>
    %121 = arith.mulf %119, %120 : vector<16x128xf32>
    %122 = vector.broadcast %99 : vector<1x128xf32> to vector<16x128xf32>
    %123 = arith.addf %121, %122 : vector<16x128xf32>
    %c0_56 = arith.constant 0 : index
    %c0_57 = arith.constant 0 : index
    %124 = vector.load %arg15[%c0_56, %c0_57] : memref<16x128xf32, #tpu.memory_space<vmem>>, vector<16x128xf32>
    tpu.vector_store %arg15[%c0_56, %c0_57], %123 {strides = array<i32>} : memref<16x128xf32, #tpu.memory_space<vmem>>, vector<16x128xf32>,
    return
  }
  func.func @transform_0(%arg0: i32) -> (i32, i32) {
    %c0_i32 = arith.constant 0 : i32
    %c0_i32_0 = arith.constant 0 : i32
    %c0_i32_1 = arith.constant 0 : i32
    return %c0_i32, %c0_i32_0 : i32, i32
  }
  func.func @transform_1(%arg0: i32) -> (i32, i32) {
    %c0_i32 = arith.constant 0 : i32
    %c0_i32_0 = arith.constant 0 : i32
    return %arg0, %c0_i32 : i32, i32
  }
  func.func @transform_2(%arg0: i32) -> (i32, i32) {
    %c0_i32 = arith.constant 0 : i32
    %c0_i32_0 = arith.constant 0 : i32
    return %arg0, %c0_i32 : i32, i32
  }
  func.func @transform_3(%arg0: i32) -> (i32, i32) {
    %c0_i32 = arith.constant 0 : i32
    %c0_i32_0 = arith.constant 0 : i32
    %c0_i32_1 = arith.constant 0 : i32
    return %c0_i32, %c0_i32_0 : i32, i32
  }
  func.func @transform_4(%arg0: i32) -> (i32, i32) {
    %c0_i32 = arith.constant 0 : i32
    %c0_i32_0 = arith.constant 0 : i32
    %c0_i32_1 = arith.constant 0 : i32
    return %c0_i32, %c0_i32_0 : i32, i32
  }
  func.func @transform_5(%arg0: i32) -> (i32, i32) {
    %c0_i32 = arith.constant 0 : i32
    %c0_i32_0 = arith.constant 0 : i32
    %c0_i32_1 = arith.constant 0 : i32
    return %c0_i32, %c0_i32_0 : i32, i32
  }
  func.func @transform_6(%arg0: i32) -> (i32, i32) {
    %c0_i32 = arith.constant 0 : i32
    %c0_i32_0 = arith.constant 0 : i32
    %c0_i32_1 = arith.constant 0 : i32
    return %c0_i32, %c0_i32_0 : i32, i32
  }
  func.func @transform_7(%arg0: i32) -> (i32, i32) {
    %c0_i32 = arith.constant 0 : i32
    %c0_i32_0 = arith.constant 0 : i32
    %c0_i32_1 = arith.constant 0 : i32
    return %c0_i32, %c0_i32_0 : i32, i32
  }
  func.func @transform_8(%arg0: i32) -> (i32, i32) {
    %c0_i32 = arith.constant 0 : i32
    %c0_i32_0 = arith.constant 0 : i32
    %c0_i32_1 = arith.constant 0 : i32
    return %c0_i32, %c0_i32_0 : i32, i32
  }
  func.func @transform_9(%arg0: i32) -> (i32, i32) {
    %c0_i32 = arith.constant 0 : i32
    %c0_i32_0 = arith.constant 0 : i32
    %c0_i32_1 = arith.constant 0 : i32
    return %c0_i32, %c0_i32_0 : i32, i32
  }
  func.func @transform_10(%arg0: i32) -> (i32, i32) {
    %c0_i32 = arith.constant 0 : i32
    %c0_i32_0 = arith.constant 0 : i32
    %c0_i32_1 = arith.constant 0 : i32
    return %c0_i32, %c0_i32_0 : i32, i32
  }
  func.func @transform_11(%arg0: i32) -> (i32, i32) {
    %c0_i32 = arith.constant 0 : i32
    %c0_i32_0 = arith.constant 0 : i32
    %c0_i32_1 = arith.constant 0 : i32
    return %c0_i32, %c0_i32_0 : i32, i32
  }
  func.func @transform_12(%arg0: i32) -> (i32, i32) {
    %c0_i32 = arith.constant 0 : i32
    %c0_i32_0 = arith.constant 0 : i32
    %c0_i32_1 = arith.constant 0 : i32
    return %c0_i32, %c0_i32_0 : i32, i32
  }
  func.func @transform_13(%arg0: i32) -> (i32, i32) {
    %c0_i32 = arith.constant 0 : i32
    %c0_i32_0 = arith.constant 0 : i32
    %c0_i32_1 = arith.constant 0 : i32
    return %c0_i32, %c0_i32_0 : i32, i32
  }
  func.func @transform_14(%arg0: i32) -> (i32, i32) {
    %c0_i32 = arith.constant 0 : i32
    %c0_i32_0 = arith.constant 0 : i32
    return %arg0, %c0_i32 : i32, i32
  }
}

module attributes {stable_mosaic.version = 11 : i64} {
  func.func @_fused_layer_kernel(%arg0: i32, %arg1: memref<16x128xf32, #tpu.memory_space<vmem>>, %arg2: memref<16x16xbf16, #tpu.memory_space<vmem>>, %arg3: memref<16x128xf32, #tpu.memory_space<vmem>>, %arg4: memref<1x128xf32, #tpu.memory_space<vmem>>, %arg5: memref<1x128xf32, #tpu.memory_space<vmem>>, %arg6: memref<1x128xf32, #tpu.memory_space<vmem>>, %arg7: memref<1x128xf32, #tpu.memory_space<vmem>>, %arg8: memref<1x128xf32, #tpu.memory_space<vmem>>, %arg9: memref<128x128xbf16, #tpu.memory_space<vmem>>, %arg10: memref<1x128xf32, #tpu.memory_space<vmem>>, %arg11: memref<128x128xbf16, #tpu.memory_space<vmem>>, %arg12: memref<1x128xf32, #tpu.memory_space<vmem>>, %arg13: memref<1x128xf32, #tpu.memory_space<vmem>>, %arg14: memref<1x128xf32, #tpu.memory_space<vmem>>, %arg15: memref<16x128xf32, #tpu.memory_space<vmem>>) attributes {dimension_semantics = [#tpu.dimension_semantics<parallel>], iteration_bounds = array<i64: 1>, scalar_prefetch = 0 : i64, scratch_operands = 0 : i64, tpu.core_type = #tpu.core_type<tc>, window_params = [{pipeline_mode = #tpu.pipeline_mode<synchronous>, transform_indices = @transform_0, window_bounds = array<i64: 16, 128>}, {transform_indices = @transform_1, window_bounds = array<i64: 16, 16>}, {transform_indices = @transform_2, window_bounds = array<i64: 16, 128>}, {pipeline_mode = #tpu.pipeline_mode<synchronous>, transform_indices = @transform_3, window_bounds = array<i64: 1, 128>}, {pipeline_mode = #tpu.pipeline_mode<synchronous>, transform_indices = @transform_4, window_bounds = array<i64: 1, 128>}, {pipeline_mode = #tpu.pipeline_mode<synchronous>, transform_indices = @transform_5, window_bounds = array<i64: 1, 128>}, {pipeline_mode = #tpu.pipeline_mode<synchronous>, transform_indices = @transform_6, window_bounds = array<i64: 1, 128>}, {pipeline_mode = #tpu.pipeline_mode<synchronous>, transform_indices = @transform_7, window_bounds = array<i64: 1, 128>}, {pipeline_mode = #tpu.pipeline_mode<synchronous>, transform_indices = @transform_8, window_bounds = array<i64: 128, 128>}, {pipeline_mode = #tpu.pipeline_mode<synchronous>, transform_indices = @transform_9, window_bounds = array<i64: 1, 128>}, {pipeline_mode = #tpu.pipeline_mode<synchronous>, transform_indices = @transform_10, window_bounds = array<i64: 128, 128>}, {pipeline_mode = #tpu.pipeline_mode<synchronous>, transform_indices = @transform_11, window_bounds = array<i64: 1, 128>}, {pipeline_mode = #tpu.pipeline_mode<synchronous>, transform_indices = @transform_12, window_bounds = array<i64: 1, 128>}, {pipeline_mode = #tpu.pipeline_mode<synchronous>, transform_indices = @transform_13, window_bounds = array<i64: 1, 128>}, {transform_indices = @transform_14, window_bounds = array<i64: 16, 128>}]} {
    %0 = tpu.iota {dimensions = array<i32: 1>} : vector<1x128xi32>
    %c32_i32 = arith.constant 32 : i32
    %1 = vector.broadcast %c32_i32 : i32 to vector<1x128xi32>
    %2 = arith.cmpi slt, %0, %1 : vector<1x128xi32>
    %c0 = arith.constant 0 : index
    %c0_0 = arith.constant 0 : index
    %3 = vector.load %arg1[%c0, %c0_0] : memref<16x128xf32, #tpu.memory_space<vmem>>, vector<16x128xf32>
    %c16_i32 = arith.constant 16 : i32
    %4 = arith.muli %arg0, %c16_i32 : i32
    %5 = tpu.assume_multiple %4, 8 : i32
    %6 = arith.index_cast %5 : i32 to index
    %c0_1 = arith.constant 0 : index
    %7 = vector.load %arg1[%6, %c0_1] : memref<16x128xf32, #tpu.memory_space<vmem>>, vector<16x128xf32>
    %c0_2 = arith.constant 0 : index
    %c0_3 = arith.constant 0 : index
    %8 = vector.load %arg5[%c0_2, %c0_3] : memref<1x128xf32, #tpu.memory_space<vmem>>, vector<1x128xf32>
    %cst = arith.constant dense<0.000000e+00> : vector<16x1xf32>
    %9 = tpu.matmul %7, %8, %cst {dimension_numbers = #tpu.dot_dimension_numbers<[1], [1], [0], [0], [0, 0, 1, 0], [], []>} : vector<16x128xf32>, vector<1x128xf32>, vector<16x1xf32> -> vector<16x1xf32>
    %c0_4 = arith.constant 0 : index
    %c0_5 = arith.constant 0 : index
    %10 = vector.load %arg4[%c0_4, %c0_5] : memref<1x128xf32, #tpu.memory_space<vmem>>, vector<1x128xf32>
    %cst_6 = arith.constant dense<0.000000e+00> : vector<1x16xf32>
    %11 = tpu.matmul %10, %3, %cst_6 {dimension_numbers = #tpu.dot_dimension_numbers<[1], [1], [0], [0], [0, 0, 1, 0], [], []>} : vector<1x128xf32>, vector<16x128xf32>, vector<1x16xf32> -> vector<1x16xf32>
    %12 = vector.broadcast %9 : vector<16x1xf32> to vector<16x16xf32>
    %13 = vector.broadcast %11 : vector<1x16xf32> to vector<16x16xf32>
    %14 = arith.addf %12, %13 : vector<16x16xf32>
    %cst_7 = arith.constant 0.000000e+00 : f32
    %15 = vector.broadcast %cst_7 : f32 to vector<16x16xf32>
    %16 = arith.cmpf ogt, %14, %15 : vector<16x16xf32>
    %cst_8 = arith.constant 2.000000e-01 : f32
    %17 = vector.broadcast %cst_8 : f32 to vector<16x16xf32>
    %18 = arith.mulf %17, %14 : vector<16x16xf32>
    %19 = arith.select %16, %14, %18 : vector<16x16xi1>, vector<16x16xf32>
    %c0_9 = arith.constant 0 : index
    %c0_10 = arith.constant 0 : index
    %20 = vector.load %arg2[%c0_9, %c0_10] : memref<16x16xbf16, #tpu.memory_space<vmem>>, vector<16x16xbf16>
    %cst_11 = arith.constant 0.000000e+00 : bf16
    %21 = vector.broadcast %cst_11 : bf16 to vector<16x16xbf16>
    %22 = arith.cmpf ogt, %20, %21 : vector<16x16xbf16>
    %cst_12 = arith.constant -1.000000e+30 : f32
    %23 = vector.broadcast %cst_12 : f32 to vector<16x16xf32>
    %24 = arith.select %22, %19, %23 : vector<16x16xi1>, vector<16x16xf32>
    %cst_13 = arith.constant dense<0xFF800000> : vector<16xf32>
    %25 = vector.multi_reduction <maximumf>, %24, %cst_13 [1] : vector<16x16xf32> to vector<16xf32>
    %26 = vector.shape_cast %25 : vector<16xf32> to vector<16x1xf32>
    %27 = vector.broadcast %26 : vector<16x1xf32> to vector<16x16xf32>
    %28 = arith.subf %24, %27 : vector<16x16xf32>
    %29 = math.exp %28 : vector<16x16xf32>
    %cst_14 = arith.constant dense<0.000000e+00> : vector<16xf32>
    %30 = vector.multi_reduction <add>, %29, %cst_14 [1] : vector<16x16xf32> to vector<16xf32>
    %31 = vector.shape_cast %30 : vector<16xf32> to vector<16x1xf32>
    %32 = arith.truncf %29 : vector<16x16xf32> to vector<16x16xbf16>
    %33 = arith.truncf %3 : vector<16x128xf32> to vector<16x128xbf16>
    %cst_15 = arith.constant dense<0.000000e+00> : vector<16x128xf32>
    %34 = tpu.matmul %32, %33, %cst_15 {dimension_numbers = #tpu.dot_dimension_numbers<[1], [0], [0], [1], [0, 0, 1, 1], [], []>} : vector<16x16xbf16>, vector<16x128xbf16>, vector<16x128xf32> -> vector<16x128xf32>
    %35 = tpu.reciprocal %31 {approx = true} : vector<16x1xf32> -> vector<16x1xf32>
    %36 = vector.broadcast %35 : vector<16x1xf32> to vector<16x128xf32>
    %37 = arith.mulf %34, %36 : vector<16x128xf32>
    %c0_16 = arith.constant 0 : index
    %c0_17 = arith.constant 0 : index
    %38 = vector.load %arg6[%c0_16, %c0_17] : memref<1x128xf32, #tpu.memory_space<vmem>>, vector<1x128xf32>
    %39 = vector.broadcast %38 : vector<1x128xf32> to vector<16x128xf32>
    %40 = arith.addf %37, %39 : vector<16x128xf32>
    %cst_18 = arith.constant 5.000000e-01 : f32
    %41 = vector.broadcast %cst_18 : f32 to vector<16x128xf32>
    %42 = arith.mulf %41, %40 : vector<16x128xf32>
    %cst_19 = arith.constant 0.707106769 : f32
    %43 = vector.broadcast %cst_19 : f32 to vector<16x128xf32>
    %44 = arith.mulf %40, %43 : vector<16x128xf32>
    %45 = math.erf %44 : vector<16x128xf32>
    %cst_20 = arith.constant 1.000000e+00 : f32
    %46 = vector.broadcast %cst_20 : f32 to vector<16x128xf32>
    %47 = arith.addf %46, %45 : vector<16x128xf32>
    %48 = arith.mulf %42, %47 : vector<16x128xf32>
    %c0_21 = arith.constant 0 : index
    %c0_22 = arith.constant 0 : index
    %49 = vector.load %arg3[%c0_21, %c0_22] : memref<16x128xf32, #tpu.memory_space<vmem>>, vector<16x128xf32>
    %50 = arith.addf %48, %49 : vector<16x128xf32>
    %c0_23 = arith.constant 0 : index
    %c0_24 = arith.constant 0 : index
    %51 = vector.load %arg7[%c0_23, %c0_24] : memref<1x128xf32, #tpu.memory_space<vmem>>, vector<1x128xf32>
    %c0_25 = arith.constant 0 : index
    %c0_26 = arith.constant 0 : index
    %52 = vector.load %arg8[%c0_25, %c0_26] : memref<1x128xf32, #tpu.memory_space<vmem>>, vector<1x128xf32>
    %cst_27 = arith.constant dense<0.000000e+00> : vector<16xf32>
    %53 = vector.multi_reduction <add>, %50, %cst_27 [1] : vector<16x128xf32> to vector<16xf32>
    %54 = vector.shape_cast %53 : vector<16xf32> to vector<16x1xf32>
    %cst_28 = arith.constant 3.125000e-02 : f32
    %55 = vector.broadcast %cst_28 : f32 to vector<16x1xf32>
    %56 = arith.mulf %54, %55 : vector<16x1xf32>
    %57 = vector.broadcast %56 : vector<16x1xf32> to vector<16x128xf32>
    %58 = arith.subf %50, %57 : vector<16x128xf32>
    %cst_29 = arith.constant 0.000000e+00 : f32
    %59 = vector.shape_cast %2 : vector<1x128xi1> to vector<1x128xi1>
    %60 = vector.broadcast %59 : vector<1x128xi1> to vector<16x128xi1>
    %61 = vector.broadcast %cst_29 : f32 to vector<16x128xf32>
    %62 = arith.select %60, %58, %61 : vector<16x128xi1>, vector<16x128xf32>
    %63 = arith.mulf %62, %62 : vector<16x128xf32>
    %cst_30 = arith.constant dense<0.000000e+00> : vector<16xf32>
    %64 = vector.multi_reduction <add>, %63, %cst_30 [1] : vector<16x128xf32> to vector<16xf32>
    %65 = vector.shape_cast %64 : vector<16xf32> to vector<16x1xf32>
    %cst_31 = arith.constant 3.125000e-02 : f32
    %66 = vector.broadcast %cst_31 : f32 to vector<16x1xf32>
    %67 = arith.mulf %65, %66 : vector<16x1xf32>
    %cst_32 = arith.constant 9.99999996E-13 : f32
    %68 = vector.broadcast %cst_32 : f32 to vector<16x1xf32>
    %69 = arith.addf %67, %68 : vector<16x1xf32>
    %70 = math.rsqrt %69 : vector<16x1xf32>
    %71 = vector.broadcast %70 : vector<16x1xf32> to vector<16x128xf32>
    %72 = arith.mulf %62, %71 : vector<16x128xf32>
    %73 = vector.broadcast %51 : vector<1x128xf32> to vector<16x128xf32>
    %74 = arith.mulf %72, %73 : vector<16x128xf32>
    %75 = vector.broadcast %52 : vector<1x128xf32> to vector<16x128xf32>
    %76 = arith.addf %74, %75 : vector<16x128xf32>
    %77 = arith.truncf %76 : vector<16x128xf32> to vector<16x128xbf16>
    %c0_33 = arith.constant 0 : index
    %c0_34 = arith.constant 0 : index
    %78 = vector.load %arg9[%c0_33, %c0_34] : memref<128x128xbf16, #tpu.memory_space<vmem>>, vector<128x128xbf16>
    %cst_35 = arith.constant dense<0.000000e+00> : vector<16x128xf32>
    %79 = tpu.matmul %77, %78, %cst_35 {dimension_numbers = #tpu.dot_dimension_numbers<[1], [0], [0], [1], [0, 0, 1, 1], [], []>} : vector<16x128xbf16>, vector<128x128xbf16>, vector<16x128xf32> -> vector<16x128xf32>
    %c0_36 = arith.constant 0 : index
    %c0_37 = arith.constant 0 : index
    %80 = vector.load %arg10[%c0_36, %c0_37] : memref<1x128xf32, #tpu.memory_space<vmem>>, vector<1x128xf32>
    %81 = vector.broadcast %80 : vector<1x128xf32> to vector<16x128xf32>
    %82 = arith.addf %79, %81 : vector<16x128xf32>
    %cst_38 = arith.constant 5.000000e-01 : f32
    %83 = vector.broadcast %cst_38 : f32 to vector<16x128xf32>
    %84 = arith.mulf %83, %82 : vector<16x128xf32>
    %cst_39 = arith.constant 0.707106769 : f32
    %85 = vector.broadcast %cst_39 : f32 to vector<16x128xf32>
    %86 = arith.mulf %82, %85 : vector<16x128xf32>
    %87 = math.erf %86 : vector<16x128xf32>
    %cst_40 = arith.constant 1.000000e+00 : f32
    %88 = vector.broadcast %cst_40 : f32 to vector<16x128xf32>
    %89 = arith.addf %88, %87 : vector<16x128xf32>
    %90 = arith.mulf %84, %89 : vector<16x128xf32>
    %91 = arith.truncf %90 : vector<16x128xf32> to vector<16x128xbf16>
    %c0_41 = arith.constant 0 : index
    %c0_42 = arith.constant 0 : index
    %92 = vector.load %arg11[%c0_41, %c0_42] : memref<128x128xbf16, #tpu.memory_space<vmem>>, vector<128x128xbf16>
    %cst_43 = arith.constant dense<0.000000e+00> : vector<16x128xf32>
    %93 = tpu.matmul %91, %92, %cst_43 {dimension_numbers = #tpu.dot_dimension_numbers<[1], [0], [0], [1], [0, 0, 1, 1], [], []>} : vector<16x128xbf16>, vector<128x128xbf16>, vector<16x128xf32> -> vector<16x128xf32>
    %c0_44 = arith.constant 0 : index
    %c0_45 = arith.constant 0 : index
    %94 = vector.load %arg12[%c0_44, %c0_45] : memref<1x128xf32, #tpu.memory_space<vmem>>, vector<1x128xf32>
    %95 = vector.broadcast %94 : vector<1x128xf32> to vector<16x128xf32>
    %96 = arith.addf %93, %95 : vector<16x128xf32>
    %97 = arith.addf %76, %96 : vector<16x128xf32>
    %c0_46 = arith.constant 0 : index
    %c0_47 = arith.constant 0 : index
    %98 = vector.load %arg13[%c0_46, %c0_47] : memref<1x128xf32, #tpu.memory_space<vmem>>, vector<1x128xf32>
    %c0_48 = arith.constant 0 : index
    %c0_49 = arith.constant 0 : index
    %99 = vector.load %arg14[%c0_48, %c0_49] : memref<1x128xf32, #tpu.memory_space<vmem>>, vector<1x128xf32>
    %cst_50 = arith.constant dense<0.000000e+00> : vector<16xf32>
    %100 = vector.multi_reduction <add>, %97, %cst_50 [1] : vector<16x128xf32> to vector<16xf32>
    %101 = vector.shape_cast %100 : vector<16xf32> to vector<16x1xf32>
    %cst_51 = arith.constant 3.125000e-02 : f32
    %102 = vector.broadcast %cst_51 : f32 to vector<16x1xf32>
    %103 = arith.mulf %101, %102 : vector<16x1xf32>
    %104 = vector.broadcast %103 : vector<16x1xf32> to vector<16x128xf32>
    %105 = arith.subf %97, %104 : vector<16x128xf32>
    %cst_52 = arith.constant 0.000000e+00 : f32
    %106 = vector.shape_cast %2 : vector<1x128xi1> to vector<1x128xi1>
    %107 = vector.broadcast %106 : vector<1x128xi1> to vector<16x128xi1>
    %108 = vector.broadcast %cst_52 : f32 to vector<16x128xf32>
    %109 = arith.select %107, %105, %108 : vector<16x128xi1>, vector<16x128xf32>
    %110 = arith.mulf %109, %109 : vector<16x128xf32>
    %cst_53 = arith.constant dense<0.000000e+00> : vector<16xf32>
    %111 = vector.multi_reduction <add>, %110, %cst_53 [1] : vector<16x128xf32> to vector<16xf32>
    %112 = vector.shape_cast %111 : vector<16xf32> to vector<16x1xf32>
    %cst_54 = arith.constant 3.125000e-02 : f32
    %113 = vector.broadcast %cst_54 : f32 to vector<16x1xf32>
    %114 = arith.mulf %112, %113 : vector<16x1xf32>
    %cst_55 = arith.constant 9.99999996E-13 : f32
    %115 = vector.broadcast %cst_55 : f32 to vector<16x1xf32>
    %116 = arith.addf %114, %115 : vector<16x1xf32>
    %117 = math.rsqrt %116 : vector<16x1xf32>
    %118 = vector.broadcast %117 : vector<16x1xf32> to vector<16x128xf32>
    %119 = arith.mulf %109, %118 : vector<16x128xf32>
    %120 = vector.broadcast %98 : vector<1x128xf32> to vector<16x128xf32>
    %121 = arith.mulf %119, %120 : vector<16x128xf32>
    %122 = vector.broadcast %99 : vector<1x128xf32> to vector<16x128xf32>
    %123 = arith.addf %121, %122 : vector<16x128xf32>
    %c0_56 = arith.constant 0 : index
    %c0_57 = arith.constant 0 : index
    %124 = vector.load %arg15[%c0_56, %c0_57] : memref<16x128xf32, #tpu.memory_space<vmem>>, vector<16x128xf32>
    tpu.vector_store %arg15[%c0_56, %c0_57], %123 {strides = array<i32>} : memref<16x128xf32, #tpu.memory_space<vmem>>, vector<16x128xf32>,
    return
  }
  func.func @transform_0(%arg0: i32) -> (i32, i32) {
    %c0_i32 = arith.constant 0 : i32
    %c0_i32_0 = arith.constant 0 : i32
    %c0_i32_1 = arith.constant 0 : i32
    return %c0_i32, %c0_i32_0 : i32, i32
  }
  func.func @transform_1(%arg0: i32) -> (i32, i32) {
    %c0_i32 = arith.constant 0 : i32
    %c0_i32_0 = arith.constant 0 : i32
    return %arg0, %c0_i32 : i32, i32
  }
  func.func @transform_2(%arg0: i32) -> (i32, i32) {
    %c0_i32 = arith.constant 0 : i32
    %c0_i32_0 = arith.constant 0 : i32
    return %arg0, %c0_i32 : i32, i32
  }
  func.func @transform_3(%arg0: i32) -> (i32, i32) {
    %c0_i32 = arith.constant 0 : i32
    %c0_i32_0 = arith.constant 0 : i32
    %c0_i32_1 = arith.constant 0 : i32
    return %c0_i32, %c0_i32_0 : i32, i32
  }
  func.func @transform_4(%arg0: i32) -> (i32, i32) {
    %c0_i32 = arith.constant 0 : i32
    %c0_i32_0 = arith.constant 0 : i32
    %c0_i32_1 = arith.constant 0 : i32
    return %c0_i32, %c0_i32_0 : i32, i32
  }
  func.func @transform_5(%arg0: i32) -> (i32, i32) {
    %c0_i32 = arith.constant 0 : i32
    %c0_i32_0 = arith.constant 0 : i32
    %c0_i32_1 = arith.constant 0 : i32
    return %c0_i32, %c0_i32_0 : i32, i32
  }
  func.func @transform_6(%arg0: i32) -> (i32, i32) {
    %c0_i32 = arith.constant 0 : i32
    %c0_i32_0 = arith.constant 0 : i32
    %c0_i32_1 = arith.constant 0 : i32
    return %c0_i32, %c0_i32_0 : i32, i32
  }
  func.func @transform_7(%arg0: i32) -> (i32, i32) {
    %c0_i32 = arith.constant 0 : i32
    %c0_i32_0 = arith.constant 0 : i32
    %c0_i32_1 = arith.constant 0 : i32
    return %c0_i32, %c0_i32_0 : i32, i32
  }
  func.func @transform_8(%arg0: i32) -> (i32, i32) {
    %c0_i32 = arith.constant 0 : i32
    %c0_i32_0 = arith.constant 0 : i32
    %c0_i32_1 = arith.constant 0 : i32
    return %c0_i32, %c0_i32_0 : i32, i32
  }
  func.func @transform_9(%arg0: i32) -> (i32, i32) {
    %c0_i32 = arith.constant 0 : i32
    %c0_i32_0 = arith.constant 0 : i32
    %c0_i32_1 = arith.constant 0 : i32
    return %c0_i32, %c0_i32_0 : i32, i32
  }
  func.func @transform_10(%arg0: i32) -> (i32, i32) {
    %c0_i32 = arith.constant 0 : i32
    %c0_i32_0 = arith.constant 0 : i32
    %c0_i32_1 = arith.constant 0 : i32
    return %c0_i32, %c0_i32_0 : i32, i32
  }
  func.func @transform_11(%arg0: i32) -> (i32, i32) {
    %c0_i32 = arith.constant 0 : i32
    %c0_i32_0 = arith.constant 0 : i32
    %c0_i32_1 = arith.constant 0 : i32
    return %c0_i32, %c0_i32_0 : i32, i32
  }
  func.func @transform_12(%arg0: i32) -> (i32, i32) {
    %c0_i32 = arith.constant 0 : i32
    %c0_i32_0 = arith.constant 0 : i32
    %c0_i32_1 = arith.constant 0 : i32
    return %c0_i32, %c0_i32_0 : i32, i32
  }
  func.func @transform_13(%arg0: i32) -> (i32, i32) {
    %c0_i32 = arith.constant 0 : i32
    %c0_i32_0 = arith.constant 0 : i32
    %c0_i32_1 = arith.constant 0 : i32
    return %c0_i32, %c0_i32_0 : i32, i32
  }
  func.func @transform_14(%arg0: i32) -> (i32, i32) {
    %c0_i32 = arith.constant 0 : i32
    %c0_i32_0 = arith.constant 0 : i32
    return %arg0, %c0_i32 : i32, i32
  }
}

module attributes {stable_mosaic.version = 11 : i64} {
  func.func @_linear_kernel(%arg0: i32, %arg1: memref<16x128xf32, #tpu.memory_space<vmem>>, %arg2: memref<128x128xbf16, #tpu.memory_space<vmem>>, %arg3: memref<1x128xf32, #tpu.memory_space<vmem>>, %arg4: memref<16x128xf32, #tpu.memory_space<vmem>>) attributes {dimension_semantics = [#tpu.dimension_semantics<parallel>], iteration_bounds = array<i64: 1>, scalar_prefetch = 0 : i64, scratch_operands = 0 : i64, tpu.core_type = #tpu.core_type<tc>, window_params = [{transform_indices = @transform_0, window_bounds = array<i64: 16, 128>}, {pipeline_mode = #tpu.pipeline_mode<synchronous>, transform_indices = @transform_1, window_bounds = array<i64: 128, 128>}, {pipeline_mode = #tpu.pipeline_mode<synchronous>, transform_indices = @transform_2, window_bounds = array<i64: 1, 128>}, {transform_indices = @transform_3, window_bounds = array<i64: 16, 128>}]} {
    %c0 = arith.constant 0 : index
    %c0_0 = arith.constant 0 : index
    %0 = vector.load %arg1[%c0, %c0_0] : memref<16x128xf32, #tpu.memory_space<vmem>>, vector<16x128xf32>
    %1 = arith.truncf %0 : vector<16x128xf32> to vector<16x128xbf16>
    %c0_1 = arith.constant 0 : index
    %c0_2 = arith.constant 0 : index
    %2 = vector.load %arg2[%c0_1, %c0_2] : memref<128x128xbf16, #tpu.memory_space<vmem>>, vector<128x128xbf16>
    %cst = arith.constant dense<0.000000e+00> : vector<16x128xf32>
    %3 = tpu.matmul %1, %2, %cst {dimension_numbers = #tpu.dot_dimension_numbers<[1], [0], [0], [1], [0, 0, 1, 1], [], []>} : vector<16x128xbf16>, vector<128x128xbf16>, vector<16x128xf32> -> vector<16x128xf32>
    %c0_3 = arith.constant 0 : index
    %c0_4 = arith.constant 0 : index
    %4 = vector.load %arg3[%c0_3, %c0_4] : memref<1x128xf32, #tpu.memory_space<vmem>>, vector<1x128xf32>
    %5 = vector.broadcast %4 : vector<1x128xf32> to vector<16x128xf32>
    %6 = arith.addf %3, %5 : vector<16x128xf32>
    %cst_5 = arith.constant 0.000000e+00 : f32
    %7 = vector.broadcast %cst_5 : f32 to vector<16x128xf32>
    %8 = arith.maximumf %6, %7 : vector<16x128xf32>
    %c0_6 = arith.constant 0 : index
    %c0_7 = arith.constant 0 : index
    %9 = vector.load %arg4[%c0_6, %c0_7] : memref<16x128xf32, #tpu.memory_space<vmem>>, vector<16x128xf32>
    tpu.vector_store %arg4[%c0_6, %c0_7], %8 {strides = array<i32>} : memref<16x128xf32, #tpu.memory_space<vmem>>, vector<16x128xf32>,
    return
  }
  func.func @transform_0(%arg0: i32) -> (i32, i32) {
    %c0_i32 = arith.constant 0 : i32
    %c0_i32_0 = arith.constant 0 : i32
    return %arg0, %c0_i32 : i32, i32
  }
  func.func @transform_1(%arg0: i32) -> (i32, i32) {
    %c0_i32 = arith.constant 0 : i32
    %c0_i32_0 = arith.constant 0 : i32
    %c0_i32_1 = arith.constant 0 : i32
    return %c0_i32, %c0_i32_0 : i32, i32
  }
  func.func @transform_2(%arg0: i32) -> (i32, i32) {
    %c0_i32 = arith.constant 0 : i32
    %c0_i32_0 = arith.constant 0 : i32
    %c0_i32_1 = arith.constant 0 : i32
    return %c0_i32, %c0_i32_0 : i32, i32
  }
  func.func @transform_3(%arg0: i32) -> (i32, i32) {
    %c0_i32 = arith.constant 0 : i32
    %c0_i32_0 = arith.constant 0 : i32
    return %arg0, %c0_i32 : i32, i32
  }
}

</mosaic_0001>

<bundles_post_ra>
// kernel: gat_forward.6
= control target key start
LH: loop header
LB: loop body
LE: loop exit
PB: predicated region body
PF: predicated region fallthrough
CT: control target
= control target key end

     0   :  { %8 = vsyncpa [#allocation3], 0  ;;  %s224_s12 = smov [#allocation2]   ;;  %s295_s0 = inlined_call_operand.vmem [shape: f32[16,128], index: 0, kind: input, shape index: {}]   ;;  %s296_s1 = inlined_call_operand.vmem [shape: bf16[128,128], index: 1, kind: input, shape index: {}]   ;;  %s297_s2 = inlined_call_operand.hbm [shape: f32[1,128], index: 2, kind: input, shape index: {}]   ;;  %s298_s3 = inlined_call_operand.vmem [shape: f32[16,128], index: 3, kind: output, shape index: {}]  }
   0x1   :  { %s19_s13 = sshll.u32 %s224_s12, 4  ;;  %s200_s16 = scalar_lea.hbm %s297_s2, 16  ;;  %s20_s13 = int_to_ptr.vmem [resolvable:$true] %s19_s13 }
   0x2   :  { %p201_p0 = scmp.ne.s32.totalorder %s297_s2, %s200_s16  ;;  %p204_p1 = scmp.lt.u32.totalorder %s200_s16, %s297_s2 }
   0x4   :  { %p206_p2 = pnand %p204_p1, %p201_p0 }
   0x6   :  { %209 = shalt.err (!%p206_p2)
}
   0x7   :  { %s210_s21 = scalar_lea.vmem %s20_s13, 16  ;;  %s214_s22 = scalar_lea.vmem %s20_s13, 32 }
   0x8   :  { %p211_p3 = scmp.ne.s32.totalorder %s20_s13, %s210_s21  ;;  %p215_p4 = scmp.lt.s32.totalorder %s20_s13, %s20_s13 }
   0x9   :  { %p216_p5 = scmp.lt.s32.totalorder %s214_s22, %s210_s21 }
   0xb   :  { %p217_p6 = por %p216_p5, %p215_p4 }
   0xd   :  { %p218_p7 = pnand %p217_p6, %p211_p3 }
   0xf   :  { %221 = shalt.err (!%p218_p7)
}
  0x10   :  { %22 = dma.hbm_to_vmem [thread:$0]  %s297_s2, 16, %s20_s13, [#allocation3]  }
  0x11   :  { %222 = dma.done.wait [#allocation3], 16  }
  0x12   :  { %223 = vsyncadd [#allocation3], 4294967280  ;;  %v225_v0 = vmov 0.0   ;;  %vm226_vm0 = vmmov 0   ;;  %v192_v1 = vld [vmem:[%s296_s1] sm:$0xff]   ;;  %v193_v2 = vld [vmem:[%s296_s1 + $0x8] sm:$0xff]  }
  0x13   :  { %169 = vmatprep.subr.bf16.mxu0 %v225_v0  ;;  %185 = vmatprep.mubr.msk.bf16.mxu0 %vm226_vm0, %v225_v0  ;;  %v194_v3 = vld [vmem:[%s296_s1 + $0x10] sm:$0xff]   ;;  %v195_v4 = vld [vmem:[%s296_s1 + $0x18] sm:$0xff]   ;;  %v196_v5 = vld [vmem:[%s296_s1 + $0x20] sm:$0xff]  }
  0x14   :  { %170 = vmatpush3.bf16.msra.mxu0 %v192_v1  ;;  %v197_v6 = vld [vmem:[%s296_s1 + $0x28] sm:$0xff]   ;;  %v198_v7 = vld [vmem:[%s296_s1 + $0x30] sm:$0xff]   ;;  %v199_v8 = vld [vmem:[%s296_s1 + $0x38] sm:$0xff]  }
  0x15   :  { %171 = vmatprep.subr.bf16.mxu0 %v225_v0  ;;  %v27_v9 = vld [vmem:[%s295_s0] sm:$0xff]  ;;  %v28_v10 = vld [vmem:[%s295_s0 + $0x8] sm:$0xff] }
  0x16   :  { %v29_v11 = vpack.c.bf16 %v28_v10, %v27_v9  ;;  %v151_v12 = vld [vmem:[#allocation2] ss:$0 sm:$0xff] }
  0x18   :  { %172 = vmatpush3.bf16.msra.mxu0 %v193_v2 }
  0x19   :  { %173 = vmatprep.subr.bf16.mxu0 %v225_v0 }
  0x1c   :  { %174 = vmatpush3.bf16.msra.mxu0 %v194_v3 }
  0x1d   :  { %175 = vmatprep.subr.bf16.mxu0 %v225_v0 }
  0x20   :  { %176 = vmatpush3.bf16.msra.mxu0 %v195_v4 }
  0x21   :  { %177 = vmatprep.subr.bf16.mxu0 %v225_v0 }
  0x24   :  { %178 = vmatpush3.bf16.msra.mxu0 %v196_v5 }
  0x25   :  { %179 = vmatprep.subr.bf16.mxu0 %v225_v0 }
  0x28   :  { %180 = vmatpush3.bf16.msra.mxu0 %v197_v6 }
  0x29   :  { %181 = vmatprep.subr.bf16.mxu0 %v225_v0 }
  0x2c   :  { %182 = vmatpush3.bf16.msra.mxu0 %v198_v7 }
  0x2d   :  { %183 = vmatprep.subr.bf16.mxu0 %v225_v0 }
  0x30   :  { %184 = vmatpush3.bf16.msra.mxu0 %v199_v8 }
  0x33   :  { %186 = vmatmul.mubr.bf16.vlgmr.msra.gmra.mrb[0].mxu0 %v29_v11 }
 0x106   :  { %v135_v13 = vpop.f32.mrb[0].mxu0 }
 0x107   :  { %v136_v14 = vadd.f32 %v151_v12, %v135_v13  ;;  %v187_v15 = vpop.f32.mrb[1].mxu0 }
 0x108   :  { %v138_v16 = vpop.f32.mrb[2].mxu0 }
 0x109   :  { %v142_v17 = vmax.f32 %v136_v14, 0.0  ;;  %v139_v18 = vadd.f32 %v151_v12, %v138_v16  ;;  %v188_v19 = vpop.f32.mrb[3].mxu0 }
 0x10b   :  { %144 = vst [vmem:[%s298_s3] sm:$0xff] %v142_v17  ;;  %v143_v20 = vmax.f32 %v139_v18, 0.0 }
 0x10d   :  { %145 = vst [vmem:[%s298_s3 + $0x8] sm:$0xff] %v143_v20 }
 0x10e   :  { %150 = vsyncpa [#allocation3], 1 }

// kernel: gat_forward.7
= control target key start
LH: loop header
LB: loop body
LE: loop exit
PB: predicated region body
PF: predicated region fallthrough
CT: control target
= control target key end

     0   :  { %v184_v0 = vmov 0.0   ;;  %vm185_vm0 = vmmov 0   ;;  %s245_s1 = inlined_call_operand.vmem [shape: bf16[128,128], index: 1, kind: input, shape index: {}]   ;;  %s246_s0 = inlined_call_operand.vmem [shape: f32[16,128], index: 0, kind: input, shape index: {}]   ;;  %s247_s2 = inlined_call_operand.vmem [shape: f32[1,128], index: 2, kind: input, shape index: {}]   ;;  %s248_s3 = inlined_call_operand.vmem [shape: f32[16,128], index: 3, kind: output, shape index: {}]  }
   0x1   :  { %154 = vmatprep.subr.bf16.mxu0 %v184_v0  ;;  %v176_v1 = vld [vmem:[%s245_s1] sm:$0xff]   ;;  %170 = vmatprep.mubr.msk.bf16.mxu0 %vm185_vm0, %v184_v0  ;;  %v177_v2 = vld [vmem:[%s245_s1 + $0x8] sm:$0xff]   ;;  %v178_v3 = vld [vmem:[%s245_s1 + $0x10] sm:$0xff]  }
   0x2   :  { %155 = vmatpush3.bf16.msra.mxu0 %v176_v1  ;;  %v179_v4 = vld [vmem:[%s245_s1 + $0x18] sm:$0xff]   ;;  %v180_v5 = vld [vmem:[%s245_s1 + $0x20] sm:$0xff]   ;;  %v181_v6 = vld [vmem:[%s245_s1 + $0x28] sm:$0xff]  }
   0x3   :  { %156 = vmatprep.subr.bf16.mxu0 %v184_v0  ;;  %v182_v7 = vld [vmem:[%s245_s1 + $0x30] sm:$0xff]   ;;  %v183_v8 = vld [vmem:[%s245_s1 + $0x38] sm:$0xff]   ;;  %v15_v9 = vld [vmem:[%s246_s0] sm:$0xff] }
   0x4   :  { %v16_v10 = vld [vmem:[%s246_s0 + $0x8] sm:$0xff]  ;;  %v136_v12 = vld [vmem:[%s247_s2] ss:$0 sm:$0xff] }
   0x5   :  { %v17_v11 = vpack.c.bf16 %v16_v10, %v15_v9 }
   0x6   :  { %157 = vmatpush3.bf16.msra.mxu0 %v177_v2 }
   0x7   :  { %158 = vmatprep.subr.bf16.mxu0 %v184_v0 }
   0xa   :  { %159 = vmatpush3.bf16.msra.mxu0 %v178_v3 }
   0xb   :  { %160 = vmatprep.subr.bf16.mxu0 %v184_v0 }
   0xe   :  { %161 = vmatpush3.bf16.msra.mxu0 %v179_v4 }
   0xf   :  { %162 = vmatprep.subr.bf16.mxu0 %v184_v0 }
  0x12   :  { %163 = vmatpush3.bf16.msra.mxu0 %v180_v5 }
  0x13   :  { %164 = vmatprep.subr.bf16.mxu0 %v184_v0 }
  0x16   :  { %165 = vmatpush3.bf16.msra.mxu0 %v181_v6 }
  0x17   :  { %166 = vmatprep.subr.bf16.mxu0 %v184_v0 }
  0x1a   :  { %167 = vmatpush3.bf16.msra.mxu0 %v182_v7 }
  0x1b   :  { %168 = vmatprep.subr.bf16.mxu0 %v184_v0 }
  0x1e   :  { %169 = vmatpush3.bf16.msra.mxu0 %v183_v8 }
  0x21   :  { %171 = vmatmul.mubr.bf16.vlgmr.msra.gmra.mrb[0].mxu0 %v17_v11 }
  0xf4   :  { %v123_v13 = vpop.f32.mrb[0].mxu0 }
  0xf5   :  { %v124_v14 = vadd.f32 %v136_v12, %v123_v13  ;;  %v172_v15 = vpop.f32.mrb[1].mxu0 }
  0xf6   :  { %v126_v16 = vpop.f32.mrb[2].mxu0 }
  0xf7   :  { %130 = vst [vmem:[%s248_s3] sm:$0xff] %v124_v14  ;;  %v127_v17 = vadd.f32 %v136_v12, %v126_v16  ;;  %v173_v18 = vpop.f32.mrb[3].mxu0 }
  0xf9   :  { %131 = vst [vmem:[%s248_s3 + $0x8] sm:$0xff] %v127_v17 }

// kernel: gat_forward.8
= control target key start
LH: loop header
LB: loop body
LE: loop exit
PB: predicated region body
PF: predicated region fallthrough
CT: control target
= control target key end

     0   :  { %19 = vsyncpa [#allocation3], 0  ;;  %s1282_s0 = inlined_call_operand.vmem [shape: f32[16,128], index: 0, kind: input, shape index: {}]   ;;  %s1283_s1 = inlined_call_operand.vmem [shape: bf16[16,16], index: 1, kind: input, shape index: {}]   ;;  %s1284_s2 = inlined_call_operand.vmem [shape: f32[16,128], index: 2, kind: input, shape index: {}]   ;;  %s1285_s3 = inlined_call_operand.hbm [shape: f32[1,128], index: 3, kind: input, shape index: {}]   ;;  %s1286_s4 = inlined_call_operand.hbm [shape: f32[1,128], index: 4, kind: input, shape index: {}]   ;;  %s1287_s5 = inlined_call_operand.hbm [shape: f32[1,128], index: 5, kind: input, shape index: {}]   ;;  %s1288_s6 = inlined_call_operand.vmem [shape: f32[1,128], index: 6, kind: input, shape index: {}]   ;;  %s1289_s7 = inlined_call_operand.vmem [shape: f32[1,128], index: 7, kind: input, shape index: {}]   ;;  %s1290_s8 = inlined_call_operand.vmem [shape: bf16[128,128], index: 8, kind: input, shape index: {}]   ;;  %s1291_s9 = inlined_call_operand.hbm [shape: f32[1,128], index: 9, kind: input, shape index: {}]   ;;  %s1292_s10 = inlined_call_operand.vmem [shape: bf16[128,128], index: 10, kind: input, shape index: {}]   ;;  %s1293_s11 = inlined_call_operand.hbm [shape: f32[1,128], index: 11, kind: input, shape index: {}]   ;;  %s1294_s12 = inlined_call_operand.hbm [shape: f32[1,128], index: 12, kind: input, shape index: {}]   ;;  %s1295_s13 = inlined_call_operand.hbm [shape: f32[1,128], index: 13, kind: input, shape index: {}]   ;;  %s1296_s14 = inlined_call_operand.vmem [shape: f32[16,128], index: 14, kind: output, shape index: {}]  }
   0x1   :  { %20 = vsyncpa [#allocation5], 0 }
   0x2   :  { %21 = vsyncpa [#allocation8], 0 }
   0x3   :  { %22 = vsyncpa [#allocation11], 0  ;;  %s991_s29 = smov [#allocation4]   ;;  %s992_s15 = smov [#allocation7]  }
   0x4   :  { %s45_s30 = sshll.u32 %s991_s29, 4  ;;  %s71_s16 = sshll.u32 %s992_s15, 4  ;;  %s46_s30 = int_to_ptr.vmem [resolvable:$true] %s45_s30  ;;  %s72_s16 = int_to_ptr.vmem [resolvable:$true] %s71_s16 }
   0x5   :  { %s829_s19 = scalar_lea.hbm %s1286_s4, 16 }
   0x6   :  { %p830_p0 = scmp.ne.s32.totalorder %s1286_s4, %s829_s19  ;;  %p833_p1 = scmp.lt.u32.totalorder %s829_s19, %s1286_s4 }
   0x8   :  { %p835_p2 = pnand %p833_p1, %p830_p0 }
   0xa   :  { %838 = shalt.err (!%p835_p2)
}
   0xb   :  { %s839_s24 = scalar_lea.vmem %s46_s30, 16  ;;  %s843_s25 = scalar_lea.vmem %s46_s30, 32 }
   0xc   :  { %p840_p3 = scmp.ne.s32.totalorder %s46_s30, %s839_s24  ;;  %p844_p4 = scmp.lt.s32.totalorder %s46_s30, %s46_s30 }
   0xd   :  { %p845_p5 = scmp.lt.s32.totalorder %s843_s25, %s839_s24 }
   0xf   :  { %p846_p6 = por %p845_p5, %p844_p4 }
  0x11   :  { %p847_p7 = pnand %p846_p6, %p840_p3 }
  0x13   :  { %850 = shalt.err (!%p847_p7)
}
  0x14   :  { %48 = dma.hbm_to_vmem [thread:$0]  %s1286_s4, 16, %s46_s30, [#allocation5]  }
  0x15   :  { %s851_s15 = scalar_lea.hbm %s1291_s9, 16 }
  0x16   :  { %p852_p8 = scmp.ne.s32.totalorder %s1291_s9, %s851_s15  ;;  %p855_p9 = scmp.lt.u32.totalorder %s851_s15, %s1291_s9 }
  0x18   :  { %p857_p10 = pnand %p855_p9, %p852_p8 }
  0x1a   :  { %860 = shalt.err (!%p857_p10)
}
  0x1b   :  { %s861_s21 = scalar_lea.vmem %s72_s16, 16  ;;  %s865_s22 = scalar_lea.vmem %s72_s16, 32 }
  0x1c   :  { %p862_p11 = scmp.ne.s32.totalorder %s72_s16, %s861_s21  ;;  %p866_p12 = scmp.lt.s32.totalorder %s72_s16, %s72_s16 }
  0x1d   :  { %p867_p13 = scmp.lt.s32.totalorder %s865_s22, %s861_s21 }
  0x1f   :  { %p868_p0 = por %p867_p13, %p866_p12 }
  0x21   :  { %p869_p1 = pnand %p868_p0, %p862_p11 }
  0x23   :  { %872 = shalt.err (!%p869_p1)
}
  0x24   :  { %74 = dma.hbm_to_vmem [thread:$0]  %s1291_s9, 16, %s72_s16, [#allocation8]  }
  0x25   :  { %s993_s23 = smov [#allocation10]   ;;  %s994_s25 = smov [#allocation2]  }
  0x26   :  { %s93_s24 = sshll.u32 %s993_s23, 4  ;;  %s35_s26 = sshll.u32 %s994_s25, 4  ;;  %s94_s24 = int_to_ptr.vmem [resolvable:$true] %s93_s24  ;;  %s36_s26 = int_to_ptr.vmem [resolvable:$true] %s35_s26 }
  0x27   :  { %s873_s29 = scalar_lea.hbm %s1294_s12, 16 }
  0x28   :  { %p874_p2 = scmp.ne.s32.totalorder %s1294_s12, %s873_s29  ;;  %p877_p3 = scmp.lt.u32.totalorder %s873_s29, %s1294_s12 }
  0x2a   :  { %p879_p4 = pnand %p877_p3, %p874_p2 }
  0x2c   :  { %882 = shalt.err (!%p879_p4)
}
  0x2d   :  { %s883_s9 = scalar_lea.vmem %s94_s24, 16  ;;  %s887_s16 = scalar_lea.vmem %s94_s24, 32 }
  0x2e   :  { %p884_p5 = scmp.ne.s32.totalorder %s94_s24, %s883_s9  ;;  %p888_p6 = scmp.lt.s32.totalorder %s94_s24, %s94_s24 }
  0x2f   :  { %p889_p7 = scmp.lt.s32.totalorder %s887_s16, %s883_s9 }
  0x31   :  { %p890_p8 = por %p889_p7, %p888_p6 }
  0x33   :  { %p891_p9 = pnand %p890_p8, %p884_p5 }
  0x35   :  { %894 = shalt.err (!%p891_p9)
}
  0x36   :  { %96 = dma.hbm_to_vmem [thread:$0]  %s1294_s12, 16, %s94_s24, [#allocation11]  }
  0x37   :  { %s895_s30 = scalar_lea.hbm %s1285_s3, 16 }
  0x38   :  { %p896_p10 = scmp.ne.s32.totalorder %s1285_s3, %s895_s30  ;;  %p899_p11 = scmp.lt.u32.totalorder %s895_s30, %s1285_s3 }
  0x3a   :  { %p901_p12 = pnand %p899_p11, %p896_p10 }
  0x3c   :  { %904 = shalt.err (!%p901_p12)
}
  0x3d   :  { %s905_s29 = scalar_lea.vmem %s36_s26, 16  ;;  %s909_s15 = scalar_lea.vmem %s36_s26, 32 }
  0x3e   :  { %p906_p13 = scmp.ne.s32.totalorder %s36_s26, %s905_s29  ;;  %p910_p0 = scmp.lt.s32.totalorder %s36_s26, %s36_s26 }
  0x3f   :  { %p911_p1 = scmp.lt.s32.totalorder %s909_s15, %s905_s29 }
  0x41   :  { %p912_p2 = por %p911_p1, %p910_p0 }
  0x43   :  { %p913_p3 = pnand %p912_p2, %p906_p13 }
  0x45   :  { %916 = shalt.err (!%p913_p3)
}
  0x46   :  { %38 = dma.hbm_to_vmem [thread:$0]  %s1285_s3, 16, %s36_s26, [#allocation3]  }
  0x47   :  { %s995_s17 = smov [#allocation6]   ;;  %s996_s19 = smov [#allocation9]  }
  0x48   :  { %s55_s18 = sshll.u32 %s995_s17, 4  ;;  %s83_s9 = sshll.u32 %s996_s19, 4  ;;  %s56_s18 = int_to_ptr.vmem [resolvable:$true] %s55_s18  ;;  %s84_s9 = int_to_ptr.vmem [resolvable:$true] %s83_s9 }
  0x49   :  { %s917_s21 = scalar_lea.hbm %s1287_s5, 16 }
  0x4a   :  { %p918_p4 = scmp.ne.s32.totalorder %s1287_s5, %s917_s21  ;;  %p921_p5 = scmp.lt.u32.totalorder %s917_s21, %s1287_s5 }
  0x4c   :  { %p923_p6 = pnand %p921_p5, %p918_p4 }
  0x4e   :  { %926 = shalt.err (!%p923_p6)
}
  0x4f   :  { %s927_s3 = scalar_lea.vmem %s56_s18, 16  ;;  %s931_s26 = scalar_lea.vmem %s56_s18, 32 }
  0x50   :  { %p928_p7 = scmp.ne.s32.totalorder %s56_s18, %s927_s3  ;;  %p932_p8 = scmp.lt.s32.totalorder %s56_s18, %s56_s18 }
  0x51   :  { %p933_p9 = scmp.lt.s32.totalorder %s931_s26, %s927_s3 }
  0x53   :  { %p934_p10 = por %p933_p9, %p932_p8 }
  0x55   :  { %p935_p11 = pnand %p934_p10, %p928_p7 }
  0x57   :  { %938 = shalt.err (!%p935_p11)
}
  0x58   :  { %58 = dma.hbm_to_vmem [thread:$0]  %s1287_s5, 16, %s56_s18, [#allocation5]  }
  0x59   :  { %s939_s15 = scalar_lea.hbm %s1293_s11, 16 }
  0x5a   :  { %p940_p12 = scmp.ne.s32.totalorder %s1293_s11, %s939_s15  ;;  %p943_p13 = scmp.lt.u32.totalorder %s939_s15, %s1293_s11 }
  0x5c   :  { %p945_p0 = pnand %p943_p13, %p940_p12 }
  0x5e   :  { %948 = shalt.err (!%p945_p0)
}
  0x5f   :  { %s949_s16 = scalar_lea.vmem %s84_s9, 16  ;;  %s953_s20 = scalar_lea.vmem %s84_s9, 32 }
  0x60   :  { %p950_p1 = scmp.ne.s32.totalorder %s84_s9, %s949_s16  ;;  %p954_p2 = scmp.lt.s32.totalorder %s84_s9, %s84_s9 }
  0x61   :  { %p955_p3 = scmp.lt.s32.totalorder %s953_s20, %s949_s16 }
  0x63   :  { %p956_p4 = por %p955_p3, %p954_p2 }
  0x65   :  { %p957_p5 = pnand %p956_p4, %p950_p1 }
  0x67   :  { %960 = shalt.err (!%p957_p5)
}
  0x68   :  { %86 = dma.hbm_to_vmem [thread:$0]  %s1293_s11, 16, %s84_s9, [#allocation8]  }
  0x69   :  { %s997_s21 = smov [#allocation12]   ;;  %s961_s23 = scalar_lea.hbm %s1295_s13, 16 }
  0x6a   :  { %s103_s22 = sshll.u32 %s997_s21, 4  ;;  %p962_p6 = scmp.ne.s32.totalorder %s1295_s13, %s961_s23  ;;  %s104_s22 = int_to_ptr.vmem [resolvable:$true] %s103_s22 }
  0x6b   :  { %p965_p7 = scmp.lt.u32.totalorder %s961_s23, %s1295_s13 }
  0x6d   :  { %p967_p8 = pnand %p965_p7, %p962_p6 }
  0x6f   :  { %970 = shalt.err (!%p967_p8)
}
  0x70   :  { %s971_s28 = scalar_lea.vmem %s104_s22, 16  ;;  %s975_s11 = scalar_lea.vmem %s104_s22, 32 }
  0x71   :  { %p972_p9 = scmp.ne.s32.totalorder %s104_s22, %s971_s28  ;;  %p976_p10 = scmp.lt.s32.totalorder %s104_s22, %s104_s22 }
  0x72   :  { %p977_p11 = scmp.lt.s32.totalorder %s975_s11, %s971_s28 }
  0x74   :  { %p978_p12 = por %p977_p11, %p976_p10 }
  0x76   :  { %p979_p13 = pnand %p978_p12, %p972_p9 }
  0x78   :  { %982 = shalt.err (!%p979_p13)
}
  0x79   :  { %106 = dma.hbm_to_vmem [thread:$0]  %s1295_s13, 16, %s104_s22, [#allocation11]  }
  0x7a   :  { %983 = dma.done.wait [#allocation3], 16  }
  0x7b   :  { %984 = vsyncadd [#allocation3], 4294967280 }
  0x7c   :  { %985 = dma.done.wait [#allocation5], 32  }
  0x7d   :  { %986 = vsyncadd [#allocation5], 4294967264 }
  0x7e   :  { %987 = dma.done.wait [#allocation8], 32  }
  0x7f   :  { %988 = vsyncadd [#allocation8], 4294967264 }
  0x80   :  { %989 = dma.done.wait [#allocation11], 32  }
  0x81   :  { %990 = vsyncadd [#allocation11], 4294967264  ;;  %v998_v0 = vmov 0.0|0.0   ;;  %vm999_vm0 = vmmov 0   ;;  %v1000_v1 = vmov 0.0   ;;  %v134_v2 = vld [vmem:[%s1282_s0] sm:$0xff]  ;;  %v131_v9 = vlaneseq }
  0x82   :  { %775 = vmatprep.subr.bf16.mxu0 %v998_v0  ;;  %726 = vmatprep.mubr.msk.f32.mxu0 %vm999_vm0, %v1000_v1  ;;  %v135_v3 = vld [vmem:[%s1282_s0 + $0x8] sm:$0xff]  ;;  %v674_v5 = vld [vmem:[#allocation4] ss:$0 sm:$0xff]  ;;  %v153_v8 = vld [vmem:[#allocation2] sm:$0x1]  ;;  %v1001_v15 = vmov 0  }
  0x83   :  { %729 = vmatprep.subr.bf16.mxu1 %v1000_v1  ;;  %731 = vmatprep.mubr.msk.bf16.mxu1 %vm999_vm0, %v1000_v1  ;;  %v776_v4 = vpack.c.bf16 %v135_v3, %v134_v2  ;;  %v147_v6 = vmul.f32 %v674_v5, %v134_v2  ;;  %v148_v7 = vmul.f32 %v674_v5, %v135_v3  ;;  %v236_v10 = vld [vmem:[%s1283_s1] sm:$0xf]  ;;  %v225_v11 = vshrl.u32 %v131_v9, 7  ;;  %v237_v13 = vld [vmem:[%s1283_s1 + $0x4] sm:$0xf]  ;;  %v337_v5 = vld [vmem:[%s1284_s2 + $0x8] sm:$0xff] }
  0x84   :  { %vm238_vm1 = vcmp.gt.bf16.partialorder %v236_v10, 0  ;;  %vm239_vm2 = vcmp.gt.bf16.partialorder %v237_v13, 0  ;;  %vm248_vm6 = vcmask 130048   ;;  %v676_v49 = vld [vmem:[#allocation6] ss:$0 sm:$0xff] }
  0x85   :  { %777 = vmatpush3.bf16.xpose.msra.mxu0 %v776_v4  ;;  %730 = vmatpush3.bf16.msra.mxu1 %v776_v4  ;;  %v226_v14 = vsub.s32 0, %v225_v11  ;;  %v240_v16 = vsel %vm238_vm1, 65537, %v1001_v15  ;;  %v241_v20 = vsel %vm239_vm2, 65537, %v1001_v15  ;;  %v336_v0 = vld [vmem:[%s1284_s2] sm:$0xff]  ;;  %v790_v11 = vld [vmem:[%s1290_s8 + $0x8] sm:$0xff]  }
  0x86   :  { %149 = vadd.xlane.f32.xlu0 %v147_v6  ;;  %735 = vmatprep.subr.bf16.mxu1 %v1000_v1  ;;  %v242_v19 = vunpack.c.l.b16 %v240_v16  ;;  %v243_v25 = vunpack.c.l.b16 %v241_v20  ;;  %v789_v10 = vld [vmem:[%s1290_s8] sm:$0xff]  }
  0x87   :  { %755 = vmatprep.subr.bf16.mxu0 %v1000_v1 }
  0x88   :  { %vm244_vm3 = vcmp.ne.s32.totalorder %v242_v19, 0  ;;  %vm245_vm7 = vcmp.ne.s32.totalorder %v243_v25, 0  ;;  %v794_v25 = vld [vmem:[%s1290_s8 + $0x28] sm:$0xff]  }
  0x8a   :  { %151 = vadd.xlane.f32.xlu0 %v148_v7 }
  0x8c   :  { %727 = vmatmul.mubr.f32.vlgmr.msra.gmra.mrb[0].mxu0 %v153_v8 }
  0x8d   :  { %771 = vmatprep.mubr.msk.bf16.mxu0 %vm999_vm0, %v1000_v1 }
 0x113   :  { %v150_v12 = vpop.xlane.xlu0 %149 }
 0x117   :  { %v152_v18 = vpop.xlane.xlu0 %151 }
 0x15f   :  { %v220_v17 = vpop.f32.mrb[0].mxu0 }
 0x160   :  { %v227_v21 = vrot.slane %v220_v17, %v226_v14  ;;  %v728_v22 = vpop.f32.mrb[1].mxu0 }
 0x162   :  { %v228_v23 = vadd.f32 %v227_v21, %v150_v12  ;;  %v229_v24 = vadd.f32 %v227_v21, %v152_v18  ;;  %v1205_v12 = vand.u32 127, %v131_v9  ;;  %v791_v9 = vld [vmem:[%s1290_s8 + $0x10] sm:$0xff]  }
 0x164   :  { %v233_v26 = vmul.f32 0.2, %v229_v24  ;;  %vm230_vm4 = vcmp.gt.f32.partialorder %v228_v23, 0.0  ;;  %v232_v27 = vmul.f32 0.2, %v228_v23  ;;  %vm231_vm5 = vcmp.gt.f32.partialorder %v229_v24, 0.0 }
 0x165   :  { %vm133_vm8 = vcmp.lt.s32.totalorder %v1205_v12, 32 }
 0x166   :  { %v234_v28 = vsel %vm230_vm4, %v228_v23, %v232_v27  ;;  %v235_v29 = vsel %vm231_vm5, %v229_v24, %v233_v26  ;;  %v792_v23 = vld [vmem:[%s1290_s8 + $0x18] sm:$0xff]   ;;  %v793_v24 = vld [vmem:[%s1290_s8 + $0x20] sm:$0xff]   ;;  %v795_v26 = vld [vmem:[%s1290_s8 + $0x30] sm:$0xff]  }
 0x167   :  { %v246_v30 = vsel %vm244_vm3, %v234_v28, -1e+30  ;;  %v247_v32 = vsel %vm245_vm7, %v235_v29, -1e+30  ;;  %v796_v27 = vld [vmem:[%s1290_s8 + $0x38] sm:$0xff]   ;;  %v797_v28 = vld [vmem:[%s1292_s10] sm:$0xff]  }
 0x168   :  { %v249_v31 = vsel %vm248_vm6, %v246_v30, -inf  ;;  %v252_v33 = vsel %vm248_vm6, %v247_v32, -inf  ;;  %756 = vmatpush3.bf16.msra.mxu0 %v797_v28  ;;  %v798_v29 = vld [vmem:[%s1292_s10 + $0x8] sm:$0xff]  }
 0x169   :  { %250 = vmax.xlane.f32.xlu1 %v249_v31  ;;  %757 = vmatprep.subr.bf16.mxu0 %v1000_v1 }
 0x16c   :  { %758 = vmatpush3.bf16.msra.mxu0 %v798_v29 }
 0x16d   :  { %253 = vmax.xlane.f32.xlu1 %v252_v33  ;;  %759 = vmatprep.subr.bf16.mxu0 %v1000_v1 }
 0x1f6   :  { %v251_v34 = vpop.xlane.xlu1 %250 }
 0x1f7   :  { %v255_v35 = vsub.f32 %v246_v30, %v251_v34 }
 0x1f9   :  { %v257_v36 = vmul.f32 1.442695, %v255_v35 }
 0x1fa   :  { %v254_v37 = vpop.xlane.xlu1 %253 }
 0x1fb   :  { %805 = vpow2.f32 %v257_v36  ;;  %v256_v38 = vsub.f32 %v247_v32, %v254_v37  ;;  %v677_v37 = vld [vmem:[%s1288_s6] ss:$0 sm:$0xff] }
 0x1fd   :  { %v259_v39 = vmul.f32 1.442695, %v256_v38 }
 0x1ff   :  { %807 = vpow2.f32 %v259_v39 }
 0x205   :  { %v806_v40 = vpop.eup %805 }
 0x206   :  { %v261_v41 = vsel %vm248_vm6, %v806_v40, 0.0 }
 0x207   :  { %262 = vadd.xlane.f32.xlu0 %v261_v41 }
 0x209   :  { %v808_v42 = vpop.eup %807 }
 0x20a   :  { %v264_v43 = vsel %vm248_vm6, %v808_v42, 0.0  ;;  %v267_v44 = vpack.c.bf16 %v808_v42, %v806_v40  ;;  %v678_v42 = vld [vmem:[%s1289_s7] ss:$0 sm:$0xff] }
 0x20b   :  { %265 = vadd.xlane.f32.xlu1 %v264_v43 }
 0x20c   :  { %732 = vmatmul.mubr.msk.bf16.vlgmr.msra.gmra.mrb[0].mxu1 %vm248_vm6, %v267_v44 }
 0x20d   :  { %751 = vmatprep.mubr.msk.bf16.mxu1 %vm999_vm0, %v1000_v1  ;;  %736 = vmatpush3.bf16.msra.mxu1 %v789_v10 }
 0x20e   :  { %737 = vmatprep.subr.bf16.mxu1 %v1000_v1 }
 0x211   :  { %738 = vmatpush3.bf16.msra.mxu1 %v790_v11 }
 0x212   :  { %739 = vmatprep.subr.bf16.mxu1 %v1000_v1 }
 0x215   :  { %740 = vmatpush3.bf16.msra.mxu1 %v791_v9 }
 0x216   :  { %741 = vmatprep.subr.bf16.mxu1 %v1000_v1 }
 0x219   :  { %742 = vmatpush3.bf16.msra.mxu1 %v792_v23 }
 0x21a   :  { %743 = vmatprep.subr.bf16.mxu1 %v1000_v1 }
 0x21d   :  { %744 = vmatpush3.bf16.msra.mxu1 %v793_v24 }
 0x21e   :  { %745 = vmatprep.subr.bf16.mxu1 %v1000_v1 }
 0x221   :  { %746 = vmatpush3.bf16.msra.mxu1 %v794_v25 }
 0x222   :  { %747 = vmatprep.subr.bf16.mxu1 %v1000_v1 }
 0x225   :  { %748 = vmatpush3.bf16.msra.mxu1 %v795_v26 }
 0x226   :  { %749 = vmatprep.subr.bf16.mxu1 %v1000_v1 }
 0x229   :  { %750 = vmatpush3.bf16.msra.mxu1 %v796_v27 }
 0x294   :  { %v263_v45 = vpop.xlane.xlu0 %262 }
 0x295   :  { %809 = vrcp.f32 %v263_v45 }
 0x298   :  { %v266_v46 = vpop.xlane.xlu1 %265 }
 0x299   :  { %811 = vrcp.f32 %v266_v46 }
 0x29f   :  { %v810_v47 = vpop.eup %809 }
 0x2a3   :  { %v812_v52 = vpop.eup %811 }
 0x2df   :  { %v306_v48 = vpop.f32.mrb[0].mxu1 }
 0x2e0   :  { %v315_v50 = vmul.f32 %v810_v47, %v306_v48  ;;  %v733_v51 = vpop.f32.mrb[1].mxu1  ;;  %v799_v47 = vld [vmem:[%s1292_s10 + $0x10] sm:$0xff]   ;;  %v800_v48 = vld [vmem:[%s1292_s10 + $0x18] sm:$0xff]  }
 0x2e1   :  { %v309_v53 = vpop.f32.mrb[2].mxu1  ;;  %760 = vmatpush3.bf16.msra.mxu0 %v799_v47  ;;  %v803_v51 = vld [vmem:[%s1292_s10 + $0x30] sm:$0xff]  }
 0x2e2   :  { %v324_v54 = vadd.f32 %v676_v49, %v315_v50  ;;  %v316_v55 = vmul.f32 %v812_v52, %v309_v53  ;;  %v734_v56 = vpop.f32.mrb[3].mxu1  ;;  %761 = vmatprep.subr.bf16.mxu0 %v1000_v1  ;;  %v802_v50 = vld [vmem:[%s1292_s10 + $0x28] sm:$0xff]   ;;  %v804_v52 = vld [vmem:[%s1292_s10 + $0x38] sm:$0xff]   ;;  %v679_v53 = vld [vmem:[#allocation7] ss:$0 sm:$0xff] }
 0x2e4   :  { %v328_v57 = vmul.f32 0.70710677, %v324_v54  ;;  %v325_v58 = vadd.f32 %v676_v49, %v316_v55  ;;  %v326_v61 = vmul.f32 0.5, %v324_v54  ;;  %v801_v49 = vld [vmem:[%s1292_s10 + $0x20] sm:$0xff]  }
 0x2e5   :  { %762 = vmatpush3.bf16.msra.mxu0 %v800_v48 }
 0x2e6   :  { %813 = verf.f32 %v328_v57  ;;  %v329_v59 = vmul.f32 0.70710677, %v325_v58  ;;  %v327_v2 = vmul.f32 0.5, %v325_v58  ;;  %763 = vmatprep.subr.bf16.mxu0 %v1000_v1 }
 0x2e8   :  { %815 = verf.f32 %v329_v59 }
 0x2e9   :  { %764 = vmatpush3.bf16.msra.mxu0 %v801_v49 }
 0x2ea   :  { %765 = vmatprep.subr.bf16.mxu0 %v1000_v1 }
 0x2ed   :  { %766 = vmatpush3.bf16.msra.mxu0 %v802_v50 }
 0x2ee   :  { %767 = vmatprep.subr.bf16.mxu0 %v1000_v1 }
 0x2f0   :  { %v814_v60 = vpop.eup %813 }
 0x2f1   :  { %v332_v62 = vadd.f32 1.0, %v814_v60  ;;  %768 = vmatpush3.bf16.msra.mxu0 %v803_v51 }
 0x2f2   :  { %v816_v63 = vpop.eup %815  ;;  %769 = vmatprep.subr.bf16.mxu0 %v1000_v1 }
 0x2f3   :  { %v334_v3 = vmul.f32 %v332_v62, %v326_v61  ;;  %v333_v4 = vadd.f32 1.0, %v816_v63 }
 0x2f5   :  { %v338_v6 = vadd.f32 %v336_v0, %v334_v3  ;;  %v335_v7 = vmul.f32 %v333_v4, %v327_v2  ;;  %770 = vmatpush3.bf16.msra.mxu0 %v804_v52 }
 0x2f7   :  { %342 = vadd.xlane.f32.xlu0 %v338_v6  ;;  %v339_v8 = vadd.f32 %v337_v5, %v335_v7  ;;  %v688_v7 = vld [vmem:[#allocation9] ss:$0 sm:$0xff] }
 0x2f9   :  { %344 = vadd.xlane.f32.xlu1 %v339_v8 }
 0x384   :  { %v343_v13 = vpop.xlane.xlu0 %342 }
 0x385   :  { %v346_v14 = vmul.f32 0.03125, %v343_v13 }
 0x386   :  { %v345_v15 = vpop.xlane.xlu1 %344 }
 0x387   :  { %v348_v16 = vsub.f32 %v338_v6, %v346_v14  ;;  %v347_v17 = vmul.f32 0.03125, %v345_v15 }
 0x389   :  { %v349_v18 = vsub.f32 %v339_v8, %v347_v17  ;;  %v352_v19 = vsel %vm133_vm8, %v348_v16, 0.0 }
 0x38a   :  { %v354_v20 = vmul.f32 %v352_v19, %v352_v19 }
 0x38b   :  { %v353_v21 = vsel %vm133_vm8, %v349_v18, 0.0 }
 0x38c   :  { %356 = vadd.xlane.f32.xlu0 %v354_v20  ;;  %v355_v22 = vmul.f32 %v353_v21, %v353_v21 }
 0x38e   :  { %358 = vadd.xlane.f32.xlu1 %v355_v22 }
 0x419   :  { %v357_v30 = vpop.xlane.xlu0 %356 }
 0x41a   :  { %v360_v31 = vmul.f32 0.03125, %v357_v30 }
 0x41b   :  { %v359_v32 = vpop.xlane.xlu1 %358 }
 0x41c   :  { %v362_v33 = vadd.f32 1e-12, %v360_v31  ;;  %v361_v34 = vmul.f32 0.03125, %v359_v32 }
 0x41e   :  { %817 = vrsqrt.f32 %v362_v33  ;;  %v363_v35 = vadd.f32 1e-12, %v361_v34  ;;  %v697_v34 = vld [vmem:[#allocation10] ss:$0 sm:$0xff] }
 0x420   :  { %819 = vrsqrt.f32 %v363_v35 }
 0x428   :  { %v818_v36 = vpop.eup %817 }
 0x429   :  { %v366_v38 = vmul.f32 %v818_v36, %v352_v19 }
 0x42a   :  { %v820_v39 = vpop.eup %819 }
 0x42b   :  { %v367_v40 = vmul.f32 %v820_v39, %v353_v21  ;;  %v374_v41 = vmul.f32 %v677_v37, %v366_v38 }
 0x42d   :  { %v375_v43 = vmul.f32 %v677_v37, %v367_v40  ;;  %v382_v44 = vadd.f32 %v678_v42, %v374_v41  ;;  %v698_v37 = vld [vmem:[#allocation12] ss:$0 sm:$0xff] }
 0x42f   :  { %v383_v45 = vadd.f32 %v678_v42, %v375_v43 }
 0x431   :  { %v384_v46 = vpack.c.bf16 %v383_v45, %v382_v44 }
 0x433   :  { %752 = vmatmul.mubr.bf16.vlgmr.msra.gmra.mrb[4].mxu1 %v384_v46 }
 0x506   :  { %v490_v54 = vpop.f32.mrb[4].mxu1 }
 0x507   :  { %v491_v55 = vadd.f32 %v679_v53, %v490_v54  ;;  %v753_v56 = vpop.f32.mrb[5].mxu1 }
 0x508   :  { %v493_v57 = vpop.f32.mrb[6].mxu1 }
 0x509   :  { %v499_v58 = vmul.f32 0.70710677, %v491_v55  ;;  %v494_v59 = vadd.f32 %v679_v53, %v493_v57  ;;  %v754_v60 = vpop.f32.mrb[7].mxu1  ;;  %v497_v1 = vmul.f32 0.5, %v491_v55 }
 0x50b   :  { %821 = verf.f32 %v499_v58  ;;  %v500_v61 = vmul.f32 0.70710677, %v494_v59  ;;  %v498_v2 = vmul.f32 0.5, %v494_v59 }
 0x50d   :  { %823 = verf.f32 %v500_v61 }
 0x515   :  { %v822_v62 = vpop.eup %821 }
 0x516   :  { %v503_v63 = vadd.f32 1.0, %v822_v62 }
 0x517   :  { %v824_v0 = vpop.eup %823 }
 0x518   :  { %v504_v3 = vadd.f32 1.0, %v824_v0  ;;  %v505_v4 = vmul.f32 %v503_v63, %v497_v1 }
 0x51a   :  { %v506_v5 = vmul.f32 %v504_v3, %v498_v2 }
 0x51c   :  { %v507_v6 = vpack.c.bf16 %v506_v5, %v505_v4 }
 0x51e   :  { %772 = vmatmul.mubr.bf16.vlgmr.msra.gmra.mrb[4].mxu0 %v507_v6 }
 0x5f1   :  { %v613_v8 = vpop.f32.mrb[4].mxu0 }
 0x5f2   :  { %v614_v10 = vadd.f32 %v688_v7, %v613_v8  ;;  %v773_v11 = vpop.f32.mrb[5].mxu0 }
 0x5f3   :  { %v616_v13 = vpop.f32.mrb[6].mxu0 }
 0x5f4   :  { %v617_v14 = vadd.f32 %v688_v7, %v616_v13  ;;  %v774_v15 = vpop.f32.mrb[7].mxu0  ;;  %v620_v16 = vadd.f32 %v614_v10, %v382_v44 }
 0x5f6   :  { %624 = vadd.xlane.f32.xlu0 %v620_v16  ;;  %v621_v17 = vadd.f32 %v617_v14, %v383_v45 }
 0x5f8   :  { %626 = vadd.xlane.f32.xlu1 %v621_v17 }
 0x683   :  { %v625_v18 = vpop.xlane.xlu0 %624 }
 0x684   :  { %v628_v19 = vmul.f32 0.03125, %v625_v18 }
 0x685   :  { %v627_v20 = vpop.xlane.xlu1 %626 }
 0x686   :  { %v630_v21 = vsub.f32 %v620_v16, %v628_v19  ;;  %v629_v22 = vmul.f32 0.03125, %v627_v20 }
 0x688   :  { %v631_v9 = vsub.f32 %v621_v17, %v629_v22  ;;  %v632_v23 = vsel %vm133_vm8, %v630_v21, 0.0 }
 0x689   :  { %v634_v24 = vmul.f32 %v632_v23, %v632_v23 }
 0x68a   :  { %v633_v25 = vsel %vm133_vm8, %v631_v9, 0.0 }
 0x68b   :  { %636 = vadd.xlane.f32.xlu0 %v634_v24  ;;  %v635_v26 = vmul.f32 %v633_v25, %v633_v25 }
 0x68d   :  { %638 = vadd.xlane.f32.xlu1 %v635_v26 }
 0x718   :  { %v637_v27 = vpop.xlane.xlu0 %636 }
 0x719   :  { %v640_v28 = vmul.f32 0.03125, %v637_v27 }
 0x71a   :  { %v639_v29 = vpop.xlane.xlu1 %638 }
 0x71b   :  { %v642_v30 = vadd.f32 1e-12, %v640_v28  ;;  %v641_v31 = vmul.f32 0.03125, %v639_v29 }
 0x71d   :  { %825 = vrsqrt.f32 %v642_v30  ;;  %v643_v32 = vadd.f32 1e-12, %v641_v31 }
 0x71f   :  { %827 = vrsqrt.f32 %v643_v32 }
 0x727   :  { %v826_v33 = vpop.eup %825 }
 0x728   :  { %v646_v35 = vmul.f32 %v826_v33, %v632_v23 }
 0x729   :  { %v828_v36 = vpop.eup %827 }
 0x72a   :  { %v654_v38 = vmul.f32 %v697_v34, %v646_v35  ;;  %v647_v39 = vmul.f32 %v828_v36, %v633_v25 }
 0x72c   :  { %v662_v12 = vadd.f32 %v698_v37, %v654_v38  ;;  %v655_v40 = vmul.f32 %v697_v34, %v647_v39 }
 0x72e   :  { %664 = vst [vmem:[%s1296_s14] sm:$0xff] %v662_v12  ;;  %v663_v41 = vadd.f32 %v698_v37, %v655_v40 }
 0x730   :  { %665 = vst [vmem:[%s1296_s14 + $0x8] sm:$0xff] %v663_v41 }
 0x731   :  { %670 = vsyncpa [#allocation3], 1 }
 0x732   :  { %671 = vsyncpa [#allocation5], 1 }
 0x733   :  { %672 = vsyncpa [#allocation8], 1 }
 0x734   :  { %673 = vsyncpa [#allocation11], 1 }

// kernel: gat_forward.10
= control target key start
LH: loop header
LB: loop body
LE: loop exit
PB: predicated region body
PF: predicated region fallthrough
CT: control target
= control target key end

     0   :  { %v737_v0 = vmov 0.0|0.0   ;;  %vm738_vm0 = vmmov 0   ;;  %v739_v3 = vmov 0.0   ;;  %v50_v9 = vlaneseq  ;;  %s958_s0 = inlined_call_operand.vmem [shape: f32[16,128], index: 0, kind: input, shape index: {}]   ;;  %s959_s4 = inlined_call_operand.vmem [shape: f32[1,128], index: 4, kind: input, shape index: {}]   ;;  %s960_s3 = inlined_call_operand.vmem [shape: f32[1,128], index: 3, kind: input, shape index: {}]   ;;  %s961_s1 = inlined_call_operand.vmem [shape: bf16[16,16], index: 1, kind: input, shape index: {}]   ;;  %s962_s5 = inlined_call_operand.vmem [shape: f32[1,128], index: 5, kind: input, shape index: {}]   ;;  %s963_s2 = inlined_call_operand.vmem [shape: f32[16,128], index: 2, kind: input, shape index: {}]   ;;  %s964_s8 = inlined_call_operand.vmem [shape: bf16[128,128], index: 8, kind: input, shape index: {}]   ;;  %s965_s10 = inlined_call_operand.vmem [shape: bf16[128,128], index: 10, kind: input, shape index: {}]   ;;  %s966_s6 = inlined_call_operand.vmem [shape: f32[1,128], index: 6, kind: input, shape index: {}]   ;;  %s967_s7 = inlined_call_operand.vmem [shape: f32[1,128], index: 7, kind: input, shape index: {}]   ;;  %s968_s9 = inlined_call_operand.vmem [shape: f32[1,128], index: 9, kind: input, shape index: {}]   ;;  %s969_s11 = inlined_call_operand.vmem [shape: f32[1,128], index: 11, kind: input, shape index: {}]   ;;  %s970_s12 = inlined_call_operand.vmem [shape: f32[1,128], index: 12, kind: input, shape index: {}]   ;;  %s971_s13 = inlined_call_operand.vmem [shape: f32[1,128], index: 13, kind: input, shape index: {}]   ;;  %s972_s14 = inlined_call_operand.vmem [shape: f32[16,128], index: 14, kind: output, shape index: {}]  }
   0x1   :  { %690 = vmatprep.subr.bf16.mxu0 %v737_v0  ;;  %v53_v1 = vld [vmem:[%s958_s0] sm:$0xff]  ;;  %v54_v2 = vld [vmem:[%s958_s0 + $0x8] sm:$0xff]  ;;  %641 = vmatprep.mubr.msk.f32.mxu0 %vm738_vm0, %v739_v3  ;;  %v740_v15 = vmov 0   ;;  %vm167_vm6 = vcmask 130048  }
   0x2   :  { %v691_v4 = vpack.c.bf16 %v54_v2, %v53_v1  ;;  %v589_v5 = vld [vmem:[%s959_s4] ss:$0 sm:$0xff]  ;;  %644 = vmatprep.subr.bf16.mxu1 %v739_v3  ;;  %646 = vmatprep.mubr.msk.bf16.mxu1 %vm738_vm0, %v739_v3  ;;  %v144_v11 = vshrl.u32 %v50_v9, 7  ;;  %v156_v13 = vld [vmem:[%s961_s1 + $0x4] sm:$0xf] }
   0x3   :  { %v66_v6 = vmul.f32 %v589_v5, %v53_v1  ;;  %v67_v7 = vmul.f32 %v589_v5, %v54_v2  ;;  %v72_v8 = vld [vmem:[%s960_s3] sm:$0x1]  ;;  %vm158_vm2 = vcmp.gt.bf16.partialorder %v156_v13, 0  ;;  %v256_v5 = vld [vmem:[%s963_s2 + $0x8] sm:$0xff] }
   0x4   :  { %692 = vmatpush3.bf16.xpose.msra.mxu0 %v691_v4  ;;  %645 = vmatpush3.bf16.msra.mxu1 %v691_v4  ;;  %v155_v10 = vld [vmem:[%s961_s1] sm:$0xf]  ;;  %v145_v14 = vsub.s32 0, %v144_v11  ;;  %v160_v20 = vsel %vm158_vm2, 65537, %v740_v15  ;;  %v698_v11 = vld [vmem:[%s964_s8 + $0x8] sm:$0xff]  }
   0x5   :  { %68 = vadd.xlane.f32.xlu0 %v66_v6  ;;  %650 = vmatprep.subr.bf16.mxu1 %v739_v3  ;;  %vm157_vm1 = vcmp.gt.bf16.partialorder %v155_v10, 0  ;;  %v162_v25 = vunpack.c.l.b16 %v160_v20  ;;  %v591_v49 = vld [vmem:[%s962_s5] ss:$0 sm:$0xff] }
   0x6   :  { %670 = vmatprep.subr.bf16.mxu0 %v739_v3  ;;  %v159_v16 = vsel %vm157_vm1, 65537, %v740_v15  ;;  %v255_v0 = vld [vmem:[%s963_s2] sm:$0xff] }
   0x7   :  { %v161_v19 = vunpack.c.l.b16 %v159_v16  ;;  %vm164_vm7 = vcmp.ne.s32.totalorder %v162_v25, 0  ;;  %v697_v10 = vld [vmem:[%s964_s8] sm:$0xff]   ;;  %v702_v25 = vld [vmem:[%s964_s8 + $0x28] sm:$0xff]  }
   0x9   :  { %70 = vadd.xlane.f32.xlu0 %v67_v7  ;;  %vm163_vm3 = vcmp.ne.s32.totalorder %v161_v19, 0 }
   0xb   :  { %642 = vmatmul.mubr.f32.vlgmr.msra.gmra.mrb[0].mxu0 %v72_v8 }
   0xc   :  { %686 = vmatprep.mubr.msk.bf16.mxu0 %vm738_vm0, %v739_v3 }
  0x92   :  { %v69_v12 = vpop.xlane.xlu0 %68 }
  0x96   :  { %v71_v18 = vpop.xlane.xlu0 %70 }
  0xde   :  { %v139_v17 = vpop.f32.mrb[0].mxu0 }
  0xdf   :  { %v146_v21 = vrot.slane %v139_v17, %v145_v14  ;;  %v643_v22 = vpop.f32.mrb[1].mxu0 }
  0xe1   :  { %v147_v23 = vadd.f32 %v146_v21, %v69_v12  ;;  %v148_v24 = vadd.f32 %v146_v21, %v71_v18  ;;  %v869_v12 = vand.u32 127, %v50_v9  ;;  %v699_v9 = vld [vmem:[%s964_s8 + $0x10] sm:$0xff]  }
  0xe3   :  { %v152_v26 = vmul.f32 0.2, %v148_v24  ;;  %vm149_vm4 = vcmp.gt.f32.partialorder %v147_v23, 0.0  ;;  %v151_v27 = vmul.f32 0.2, %v147_v23  ;;  %vm150_vm5 = vcmp.gt.f32.partialorder %v148_v24, 0.0 }
  0xe4   :  { %vm52_vm8 = vcmp.lt.s32.totalorder %v869_v12, 32  ;;  %v613_v12 = vld [vmem:[%s971_s13] ss:$0 sm:$0xff] }
  0xe5   :  { %v153_v28 = vsel %vm149_vm4, %v147_v23, %v151_v27  ;;  %v154_v29 = vsel %vm150_vm5, %v148_v24, %v152_v26  ;;  %v700_v23 = vld [vmem:[%s964_s8 + $0x18] sm:$0xff]   ;;  %v701_v24 = vld [vmem:[%s964_s8 + $0x20] sm:$0xff]   ;;  %v703_v26 = vld [vmem:[%s964_s8 + $0x30] sm:$0xff]  }
  0xe6   :  { %v165_v30 = vsel %vm163_vm3, %v153_v28, -1e+30  ;;  %v166_v32 = vsel %vm164_vm7, %v154_v29, -1e+30  ;;  %v704_v27 = vld [vmem:[%s964_s8 + $0x38] sm:$0xff]   ;;  %v705_v28 = vld [vmem:[%s965_s10] sm:$0xff]  }
  0xe7   :  { %v168_v31 = vsel %vm167_vm6, %v165_v30, -inf  ;;  %v171_v33 = vsel %vm167_vm6, %v166_v32, -inf  ;;  %671 = vmatpush3.bf16.msra.mxu0 %v705_v28  ;;  %v706_v29 = vld [vmem:[%s965_s10 + $0x8] sm:$0xff]  }
  0xe8   :  { %169 = vmax.xlane.f32.xlu1 %v168_v31  ;;  %672 = vmatprep.subr.bf16.mxu0 %v739_v3 }
  0xeb   :  { %673 = vmatpush3.bf16.msra.mxu0 %v706_v29 }
  0xec   :  { %172 = vmax.xlane.f32.xlu1 %v171_v33  ;;  %674 = vmatprep.subr.bf16.mxu0 %v739_v3 }
 0x175   :  { %v170_v34 = vpop.xlane.xlu1 %169 }
 0x176   :  { %v174_v35 = vsub.f32 %v165_v30, %v170_v34 }
 0x178   :  { %v176_v36 = vmul.f32 1.442695, %v174_v35 }
 0x179   :  { %v173_v37 = vpop.xlane.xlu1 %172 }
 0x17a   :  { %713 = vpow2.f32 %v176_v36  ;;  %v175_v38 = vsub.f32 %v166_v32, %v173_v37  ;;  %v592_v37 = vld [vmem:[%s966_s6] ss:$0 sm:$0xff] }
 0x17c   :  { %v178_v39 = vmul.f32 1.442695, %v175_v38 }
 0x17e   :  { %715 = vpow2.f32 %v178_v39 }
 0x184   :  { %v714_v40 = vpop.eup %713 }
 0x185   :  { %v180_v41 = vsel %vm167_vm6, %v714_v40, 0.0 }
 0x186   :  { %181 = vadd.xlane.f32.xlu0 %v180_v41 }
 0x188   :  { %v716_v42 = vpop.eup %715 }
 0x189   :  { %v183_v43 = vsel %vm167_vm6, %v716_v42, 0.0  ;;  %v186_v44 = vpack.c.bf16 %v716_v42, %v714_v40  ;;  %v593_v42 = vld [vmem:[%s967_s7] ss:$0 sm:$0xff] }
 0x18a   :  { %184 = vadd.xlane.f32.xlu1 %v183_v43 }
 0x18b   :  { %647 = vmatmul.mubr.msk.bf16.vlgmr.msra.gmra.mrb[0].mxu1 %vm167_vm6, %v186_v44 }
 0x18c   :  { %666 = vmatprep.mubr.msk.bf16.mxu1 %vm738_vm0, %v739_v3  ;;  %651 = vmatpush3.bf16.msra.mxu1 %v697_v10 }
 0x18d   :  { %652 = vmatprep.subr.bf16.mxu1 %v739_v3 }
 0x190   :  { %653 = vmatpush3.bf16.msra.mxu1 %v698_v11 }
 0x191   :  { %654 = vmatprep.subr.bf16.mxu1 %v739_v3 }
 0x194   :  { %655 = vmatpush3.bf16.msra.mxu1 %v699_v9 }
 0x195   :  { %656 = vmatprep.subr.bf16.mxu1 %v739_v3 }
 0x198   :  { %657 = vmatpush3.bf16.msra.mxu1 %v700_v23 }
 0x199   :  { %658 = vmatprep.subr.bf16.mxu1 %v739_v3 }
 0x19c   :  { %659 = vmatpush3.bf16.msra.mxu1 %v701_v24 }
 0x19d   :  { %660 = vmatprep.subr.bf16.mxu1 %v739_v3 }
 0x1a0   :  { %661 = vmatpush3.bf16.msra.mxu1 %v702_v25 }
 0x1a1   :  { %662 = vmatprep.subr.bf16.mxu1 %v739_v3 }
 0x1a4   :  { %663 = vmatpush3.bf16.msra.mxu1 %v703_v26 }
 0x1a5   :  { %664 = vmatprep.subr.bf16.mxu1 %v739_v3 }
 0x1a8   :  { %665 = vmatpush3.bf16.msra.mxu1 %v704_v27 }
 0x213   :  { %v182_v45 = vpop.xlane.xlu0 %181 }
 0x214   :  { %717 = vrcp.f32 %v182_v45 }
 0x217   :  { %v185_v46 = vpop.xlane.xlu1 %184 }
 0x218   :  { %719 = vrcp.f32 %v185_v46 }
 0x21e   :  { %v718_v47 = vpop.eup %717 }
 0x222   :  { %v720_v52 = vpop.eup %719 }
 0x25e   :  { %v225_v48 = vpop.f32.mrb[0].mxu1 }
 0x25f   :  { %v234_v50 = vmul.f32 %v718_v47, %v225_v48  ;;  %v648_v51 = vpop.f32.mrb[1].mxu1  ;;  %v707_v47 = vld [vmem:[%s965_s10 + $0x10] sm:$0xff]   ;;  %v708_v48 = vld [vmem:[%s965_s10 + $0x18] sm:$0xff]  }
 0x260   :  { %v228_v53 = vpop.f32.mrb[2].mxu1  ;;  %675 = vmatpush3.bf16.msra.mxu0 %v707_v47  ;;  %v711_v51 = vld [vmem:[%s965_s10 + $0x30] sm:$0xff]  }
 0x261   :  { %v243_v54 = vadd.f32 %v591_v49, %v234_v50  ;;  %v235_v55 = vmul.f32 %v720_v52, %v228_v53  ;;  %v649_v56 = vpop.f32.mrb[3].mxu1  ;;  %676 = vmatprep.subr.bf16.mxu0 %v739_v3  ;;  %v710_v50 = vld [vmem:[%s965_s10 + $0x28] sm:$0xff]   ;;  %v712_v52 = vld [vmem:[%s965_s10 + $0x38] sm:$0xff]   ;;  %v594_v53 = vld [vmem:[%s968_s9] ss:$0 sm:$0xff] }
 0x263   :  { %v247_v57 = vmul.f32 0.70710677, %v243_v54  ;;  %v244_v58 = vadd.f32 %v591_v49, %v235_v55  ;;  %v245_v61 = vmul.f32 0.5, %v243_v54  ;;  %v709_v49 = vld [vmem:[%s965_s10 + $0x20] sm:$0xff]  }
 0x264   :  { %677 = vmatpush3.bf16.msra.mxu0 %v708_v48 }
 0x265   :  { %721 = verf.f32 %v247_v57  ;;  %v248_v59 = vmul.f32 0.70710677, %v244_v58  ;;  %v246_v1 = vmul.f32 0.5, %v244_v58  ;;  %678 = vmatprep.subr.bf16.mxu0 %v739_v3 }
 0x267   :  { %723 = verf.f32 %v248_v59 }
 0x268   :  { %679 = vmatpush3.bf16.msra.mxu0 %v709_v49 }
 0x269   :  { %680 = vmatprep.subr.bf16.mxu0 %v739_v3 }
 0x26c   :  { %681 = vmatpush3.bf16.msra.mxu0 %v710_v50 }
 0x26d   :  { %682 = vmatprep.subr.bf16.mxu0 %v739_v3 }
 0x26f   :  { %v722_v60 = vpop.eup %721 }
 0x270   :  { %v251_v62 = vadd.f32 1.0, %v722_v60  ;;  %683 = vmatpush3.bf16.msra.mxu0 %v711_v51 }
 0x271   :  { %v724_v63 = vpop.eup %723  ;;  %684 = vmatprep.subr.bf16.mxu0 %v739_v3 }
 0x272   :  { %v253_v2 = vmul.f32 %v251_v62, %v245_v61  ;;  %v252_v4 = vadd.f32 1.0, %v724_v63 }
 0x274   :  { %v257_v6 = vadd.f32 %v255_v0, %v253_v2  ;;  %v254_v7 = vmul.f32 %v252_v4, %v246_v1  ;;  %685 = vmatpush3.bf16.msra.mxu0 %v712_v52 }
 0x276   :  { %261 = vadd.xlane.f32.xlu0 %v257_v6  ;;  %v258_v8 = vadd.f32 %v256_v5, %v254_v7  ;;  %v603_v7 = vld [vmem:[%s969_s11] ss:$0 sm:$0xff] }
 0x278   :  { %263 = vadd.xlane.f32.xlu1 %v258_v8 }
 0x303   :  { %v262_v13 = vpop.xlane.xlu0 %261 }
 0x304   :  { %v265_v14 = vmul.f32 0.03125, %v262_v13 }
 0x305   :  { %v264_v15 = vpop.xlane.xlu1 %263 }
 0x306   :  { %v267_v16 = vsub.f32 %v257_v6, %v265_v14  ;;  %v266_v17 = vmul.f32 0.03125, %v264_v15 }
 0x308   :  { %v268_v18 = vsub.f32 %v258_v8, %v266_v17  ;;  %v271_v19 = vsel %vm52_vm8, %v267_v16, 0.0 }
 0x309   :  { %v273_v20 = vmul.f32 %v271_v19, %v271_v19 }
 0x30a   :  { %v272_v21 = vsel %vm52_vm8, %v268_v18, 0.0 }
 0x30b   :  { %275 = vadd.xlane.f32.xlu0 %v273_v20  ;;  %v274_v22 = vmul.f32 %v272_v21, %v272_v21 }
 0x30d   :  { %277 = vadd.xlane.f32.xlu1 %v274_v22 }
 0x398   :  { %v276_v30 = vpop.xlane.xlu0 %275 }
 0x399   :  { %v279_v31 = vmul.f32 0.03125, %v276_v30 }
 0x39a   :  { %v278_v32 = vpop.xlane.xlu1 %277 }
 0x39b   :  { %v281_v33 = vadd.f32 1e-12, %v279_v31  ;;  %v280_v34 = vmul.f32 0.03125, %v278_v32 }
 0x39d   :  { %725 = vrsqrt.f32 %v281_v33  ;;  %v282_v35 = vadd.f32 1e-12, %v280_v34  ;;  %v612_v34 = vld [vmem:[%s970_s12] ss:$0 sm:$0xff] }
 0x39f   :  { %727 = vrsqrt.f32 %v282_v35 }
 0x3a7   :  { %v726_v36 = vpop.eup %725 }
 0x3a8   :  { %v285_v38 = vmul.f32 %v726_v36, %v271_v19 }
 0x3a9   :  { %v728_v39 = vpop.eup %727 }
 0x3aa   :  { %v286_v40 = vmul.f32 %v728_v39, %v272_v21  ;;  %v293_v41 = vmul.f32 %v592_v37, %v285_v38 }
 0x3ac   :  { %v294_v43 = vmul.f32 %v592_v37, %v286_v40  ;;  %v301_v44 = vadd.f32 %v593_v42, %v293_v41 }
 0x3ae   :  { %v302_v45 = vadd.f32 %v593_v42, %v294_v43 }
 0x3b0   :  { %v303_v46 = vpack.c.bf16 %v302_v45, %v301_v44 }
 0x3b2   :  { %667 = vmatmul.mubr.bf16.vlgmr.msra.gmra.mrb[4].mxu1 %v303_v46 }
 0x485   :  { %v409_v54 = vpop.f32.mrb[4].mxu1 }
 0x486   :  { %v410_v55 = vadd.f32 %v594_v53, %v409_v54  ;;  %v668_v56 = vpop.f32.mrb[5].mxu1 }
 0x487   :  { %v412_v57 = vpop.f32.mrb[6].mxu1 }
 0x488   :  { %v418_v58 = vmul.f32 0.70710677, %v410_v55  ;;  %v413_v59 = vadd.f32 %v594_v53, %v412_v57  ;;  %v669_v60 = vpop.f32.mrb[7].mxu1  ;;  %v416_v0 = vmul.f32 0.5, %v410_v55 }
 0x48a   :  { %729 = verf.f32 %v418_v58  ;;  %v419_v61 = vmul.f32 0.70710677, %v413_v59  ;;  %v417_v1 = vmul.f32 0.5, %v413_v59 }
 0x48c   :  { %731 = verf.f32 %v419_v61 }
 0x494   :  { %v730_v3 = vpop.eup %729 }
 0x495   :  { %v422_v62 = vadd.f32 1.0, %v730_v3 }
 0x496   :  { %v732_v63 = vpop.eup %731 }
 0x497   :  { %v423_v2 = vadd.f32 1.0, %v732_v63  ;;  %v424_v4 = vmul.f32 %v422_v62, %v416_v0 }
 0x499   :  { %v425_v5 = vmul.f32 %v423_v2, %v417_v1 }
 0x49b   :  { %v426_v6 = vpack.c.bf16 %v425_v5, %v424_v4 }
 0x49d   :  { %687 = vmatmul.mubr.bf16.vlgmr.msra.gmra.mrb[4].mxu0 %v426_v6 }
 0x570   :  { %v532_v8 = vpop.f32.mrb[4].mxu0 }
 0x571   :  { %v533_v10 = vadd.f32 %v603_v7, %v532_v8  ;;  %v688_v11 = vpop.f32.mrb[5].mxu0 }
 0x572   :  { %v535_v13 = vpop.f32.mrb[6].mxu0 }
 0x573   :  { %v536_v14 = vadd.f32 %v603_v7, %v535_v13  ;;  %v689_v15 = vpop.f32.mrb[7].mxu0  ;;  %v539_v16 = vadd.f32 %v533_v10, %v301_v44 }
 0x575   :  { %543 = vadd.xlane.f32.xlu0 %v539_v16  ;;  %v540_v17 = vadd.f32 %v536_v14, %v302_v45 }
 0x577   :  { %545 = vadd.xlane.f32.xlu1 %v540_v17 }
 0x602   :  { %v544_v18 = vpop.xlane.xlu0 %543 }
 0x603   :  { %v547_v19 = vmul.f32 0.03125, %v544_v18 }
 0x604   :  { %v546_v20 = vpop.xlane.xlu1 %545 }
 0x605   :  { %v549_v21 = vsub.f32 %v539_v16, %v547_v19  ;;  %v548_v22 = vmul.f32 0.03125, %v546_v20 }
 0x607   :  { %v550_v9 = vsub.f32 %v540_v17, %v548_v22  ;;  %v551_v23 = vsel %vm52_vm8, %v549_v21, 0.0 }
 0x608   :  { %v553_v24 = vmul.f32 %v551_v23, %v551_v23 }
 0x609   :  { %v552_v25 = vsel %vm52_vm8, %v550_v9, 0.0 }
 0x60a   :  { %555 = vadd.xlane.f32.xlu0 %v553_v24  ;;  %v554_v26 = vmul.f32 %v552_v25, %v552_v25 }
 0x60c   :  { %557 = vadd.xlane.f32.xlu1 %v554_v26 }
 0x697   :  { %v556_v27 = vpop.xlane.xlu0 %555 }
 0x698   :  { %v559_v28 = vmul.f32 0.03125, %v556_v27 }
 0x699   :  { %v558_v29 = vpop.xlane.xlu1 %557 }
 0x69a   :  { %v561_v30 = vadd.f32 1e-12, %v559_v28  ;;  %v560_v31 = vmul.f32 0.03125, %v558_v29 }
 0x69c   :  { %733 = vrsqrt.f32 %v561_v30  ;;  %v562_v32 = vadd.f32 1e-12, %v560_v31 }
 0x69e   :  { %735 = vrsqrt.f32 %v562_v32 }
 0x6a6   :  { %v734_v33 = vpop.eup %733 }
 0x6a7   :  { %v565_v35 = vmul.f32 %v734_v33, %v551_v23 }
 0x6a8   :  { %v736_v36 = vpop.eup %735 }
 0x6a9   :  { %v573_v37 = vmul.f32 %v612_v34, %v565_v35  ;;  %v566_v38 = vmul.f32 %v736_v36, %v552_v25 }
 0x6ab   :  { %v581_v39 = vadd.f32 %v613_v12, %v573_v37  ;;  %v574_v40 = vmul.f32 %v612_v34, %v566_v38 }
 0x6ad   :  { %583 = vst [vmem:[%s972_s14] sm:$0xff] %v581_v39  ;;  %v582_v41 = vadd.f32 %v613_v12, %v574_v40 }
 0x6af   :  { %584 = vst [vmem:[%s972_s14 + $0x8] sm:$0xff] %v582_v41 }

// kernel: gat_forward.11
= control target key start
LH: loop header
LB: loop body
LE: loop exit
PB: predicated region body
PF: predicated region fallthrough
CT: control target
= control target key end

     0   :  { %v226_v1 = vmov 0.0   ;;  %vm227_vm0 = vmmov 0   ;;  %s296_s0 = inlined_call_operand.vmem [shape: f32[16,128], index: 0, kind: input, shape index: {}]   ;;  %s297_s1 = inlined_call_operand.vmem [shape: bf16[128,128], index: 1, kind: input, shape index: {}]   ;;  %s298_s2 = inlined_call_operand.vmem [shape: f32[1,128], index: 2, kind: input, shape index: {}]   ;;  %s299_s3 = inlined_call_operand.hbm [shape: f32[16,128], index: 3, kind: output, shape index: {}]  }
   0x1   :  { %v194_v0 = vld [vmem:[%s297_s1] sm:$0xff]   ;;  %169 = vmatprep.subr.bf16.mxu0 %v226_v1  ;;  %v195_v2 = vld [vmem:[%s297_s1 + $0x8] sm:$0xff]   ;;  %185 = vmatprep.mubr.msk.bf16.mxu0 %vm227_vm0, %v226_v1  ;;  %v196_v3 = vld [vmem:[%s297_s1 + $0x10] sm:$0xff]  }
   0x2   :  { %170 = vmatpush3.bf16.msra.mxu0 %v194_v0 }
   0x3   :  { %171 = vmatprep.subr.bf16.mxu0 %v226_v1 }
   0x6   :  { %172 = vmatpush3.bf16.msra.mxu0 %v195_v2 }
   0x7   :  { %173 = vmatprep.subr.bf16.mxu0 %v226_v1 }
   0x8   :  { %8 = vsyncpa [#allocation3], 0  ;;  %v197_v4 = vld [vmem:[%s297_s1 + $0x18] sm:$0xff]   ;;  %v198_v5 = vld [vmem:[%s297_s1 + $0x20] sm:$0xff]  }
   0x9   :  { %v199_v6 = vld [vmem:[%s297_s1 + $0x28] sm:$0xff]   ;;  %v200_v7 = vld [vmem:[%s297_s1 + $0x30] sm:$0xff]   ;;  %v201_v8 = vld [vmem:[%s297_s1 + $0x38] sm:$0xff]   ;;  %s228_s1 = smov [#allocation2]  }
   0xa   :  { %174 = vmatpush3.bf16.msra.mxu0 %v196_v3  ;;  %v16_v9 = vld [vmem:[%s296_s0] sm:$0xff]  ;;  %v17_v10 = vld [vmem:[%s296_s0 + $0x8] sm:$0xff]  ;;  %s140_s7 = sshll.u32 %s228_s1, 4  ;;  %s141_s7 = int_to_ptr.vmem [resolvable:$true] %s140_s7 }
   0xb   :  { %175 = vmatprep.subr.bf16.mxu0 %v226_v1  ;;  %v18_v11 = vpack.c.bf16 %v17_v10, %v16_v9  ;;  %v151_v12 = vld [vmem:[%s298_s2] ss:$0 sm:$0xff]  ;;  %s202_s0 = scalar_lea.vmem %s141_s7, 256  ;;  %p207_p1 = scmp.lt.s32.totalorder %s141_s7, %s141_s7 }
   0xc   :  { %p203_p0 = scmp.ne.s32.totalorder %s141_s7, %s202_s0  ;;  %p208_p2 = scmp.lt.s32.totalorder %s202_s0, %s202_s0 }
   0xe   :  { %176 = vmatpush3.bf16.msra.mxu0 %v197_v4  ;;  %p209_p3 = por %p208_p2, %p207_p1 }
   0xf   :  { %177 = vmatprep.subr.bf16.mxu0 %v226_v1 }
  0x10   :  { %p210_p4 = pnand %p209_p3, %p203_p0 }
  0x12   :  { %178 = vmatpush3.bf16.msra.mxu0 %v198_v5 }
  0x13   :  { %179 = vmatprep.subr.bf16.mxu0 %v226_v1 }
  0x16   :  { %180 = vmatpush3.bf16.msra.mxu0 %v199_v6 }
  0x17   :  { %181 = vmatprep.subr.bf16.mxu0 %v226_v1 }
  0x1a   :  { %182 = vmatpush3.bf16.msra.mxu0 %v200_v7 }
  0x1b   :  { %183 = vmatprep.subr.bf16.mxu0 %v226_v1 }
  0x1e   :  { %184 = vmatpush3.bf16.msra.mxu0 %v201_v8 }
  0x21   :  { %186 = vmatmul.mubr.bf16.vlgmr.msra.gmra.mrb[0].mxu0 %v18_v11 }
  0xf4   :  { %v124_v13 = vpop.f32.mrb[0].mxu0 }
  0xf5   :  { %v125_v14 = vadd.f32 %v151_v12, %v124_v13  ;;  %v187_v15 = vpop.f32.mrb[1].mxu0 }
  0xf6   :  { %v127_v16 = vpop.f32.mrb[2].mxu0 }
  0xf7   :  { %v131_v17 = vmax.f32 %v125_v14, 0.0  ;;  %v128_v18 = vadd.f32 %v151_v12, %v127_v16  ;;  %v188_v19 = vpop.f32.mrb[3].mxu0 }
  0xf9   :  { %133 = vst [vmem:[#allocation2] sm:$0xff] %v131_v17  ;;  %v132_v20 = vmax.f32 %v128_v18, 0.0 }
  0xfb   :  { %134 = vst [vmem:[#allocation2 + $0x8] sm:$0xff] %v132_v20 }
  0xfc   :  { %213 = shalt.err (!%p210_p4)
}
  0xfd   :  { %s214_s9 = scalar_lea.hbm %s299_s3, 256 }
  0xfe   :  { %p215_p5 = scmp.ne.s32.totalorder %s299_s3, %s214_s9  ;;  %p218_p6 = scmp.lt.u32.totalorder %s214_s9, %s299_s3 }
 0x100   :  { %p220_p7 = pnand %p218_p6, %p215_p5 }
 0x102   :  { %223 = shalt.err (!%p220_p7)
}
 0x103   :  { %s229_s14 = smov 128   ;;  %s230_s15 = smov 8  }
 0x104   :  { %146 = dma.vmem_to_hbm [thread:$0]  %s141_s7, 256, %s299_s3, [#allocation3], %s229_s14, %s229_s14, %s230_s15  }
 0x105   :  { %224 = dma.done.wait [#allocation3], 256  }
 0x106   :  { %225 = vsyncadd [#allocation3], 4294967040 }
 0x107   :  { %150 = vsyncpa [#allocation3], 1 }

</bundles_post_ra>
